<compile_context>
chip_gen: v5e
topology: v5e:2x2
jax: 0.10.0
libtpu: 0.0.40
codegen_flags: <defaults>
</compile_context>

<pallas_src>
import jax
import jax.numpy as jnp
from jax.experimental import pallas as pl
from jax.experimental.pallas import tpu as pltpu


# ----------------------------- config (small, synthetic) ---------------------
B = 2               # batch
S = 8               # seq_len
DIM = 32            # model dim
N_HEADS = 4
N_KV_HEADS = 2
HEAD_DIM = 8
N_GROUPS = N_HEADS // N_KV_HEADS            # num_key_value_groups
HALF = HEAD_DIM // 2
Q_WIDTH = N_HEADS * HEAD_DIM                # 32
KV_WIDTH = N_KV_HEADS * HEAD_DIM            # 16
QKV_WIDTH = Q_WIDTH + 2 * KV_WIDTH          # 64
OUT_WIDTH = DIM + 2 * KV_WIDTH              # 64 : [ y | rotated K | V ]
K_OFF = DIM
V_OFF = DIM + KV_WIDTH
SCALE = float(HEAD_DIM) ** 0.5
INV_SCALE = 1.0 / SCALE


# ----------------------------- fused Pallas kernel ----------------------------
def _fused_attn_kernel(x_ref, wqkv_ref, wo_ref, cos_ref, sin_ref, mask_ref,
                       out_ref):
    """Single invocation: fused QKV proj + RoPE + GQA attention + wo projection.

    x_ref    : (B*S, DIM)
    wqkv_ref : (DIM, QKV_WIDTH)   (Q columns pre-scaled by 1/sqrt(head_dim))
    wo_ref   : (Q_WIDTH, DIM)
    cos_ref  : (S, HALF)
    sin_ref  : (S, HALF)
    mask_ref : (B, S, S) additive mask
    out_ref  : (B*S, OUT_WIDTH) fused slab  [ y | rotated K | V ]
    """
    # One MXU matmul for the whole batch's Q, K and V projections.
    qkv = jnp.dot(x_ref[...], wqkv_ref[...], preferred_element_type=jnp.float32)

    c = cos_ref[...]                     # (S, HALF)
    s = sin_ref[...]                     # (S, HALF)

    # V needs no RoPE: one direct lane-offset store for all batches.
    out_ref[:, V_OFF:] = qkv[:, Q_WIDTH + KV_WIDTH:]

    for b in range(B):                   # static unroll; B is tiny
        r0 = b * S
        qkv_b = qkv[r0:r0 + S, :]        # (S, QKV_WIDTH), sublane-aligned slice
        mask_b = mask_ref[b]             # (S, S)

        acc = None                       # running sum_h  y_h @ wo[h rows]
        for g in range(N_KV_HEADS):
            # --- K: projected + RoPE'd exactly once per kv head ---------------
            kb = Q_WIDTH + g * HEAD_DIM
            k_r = qkv_b[:, kb:kb + HALF]
            k_i = qkv_b[:, kb + HALF:kb + HEAD_DIM]
            ko_r = k_r * c - k_i * s                      # (S, HALF)
            ko_i = k_r * s + k_i * c
            # Rotated K written straight into the fused slab (natural [r|i] order).
            out_ref[r0:r0 + S, K_OFF + g * HEAD_DIM:
                               K_OFF + g * HEAD_DIM + HALF] = ko_r
            out_ref[r0:r0 + S, K_OFF + g * HEAD_DIM + HALF:
                               K_OFF + (g + 1) * HEAD_DIM] = ko_i

            v_g = qkv_b[:, Q_WIDTH + KV_WIDTH + g * HEAD_DIM:
                           Q_WIDTH + KV_WIDTH + (g + 1) * HEAD_DIM]  # (S, hd)

            # --- query heads sharing this kv head -----------------------------
            for li in range(N_GROUPS):
                h = g * N_GROUPS + li
                qb = h * HEAD_DIM
                q_r = qkv_b[:, qb:qb + HALF]              # already 1/sqrt(hd)-scaled
                q_i = qkv_b[:, qb + HALF:qb + HEAD_DIM]
                qo_r = q_r * c - q_i * s
                qo_i = q_r * s + q_i * c

                # Scores are invariant to a consistent head-dim permutation, so
                # the rotated halves never need to be re-concatenated.
                scores = (jnp.dot(qo_r, ko_r.T, preferred_element_type=jnp.float32)
                          + jnp.dot(qo_i, ko_i.T, preferred_element_type=jnp.float32)
                          + mask_b)                       # (S, S)

                m = jnp.max(scores, axis=-1, keepdims=True)
                e = jnp.exp(scores - m)
                denom = jnp.sum(e, axis=-1, keepdims=True)
                # 1/denom applied after PV: scales (S, hd), not (S, S).
                # approx=True is a free EUP win in production; exact here so the
                # f32 reference check stays tight.
                y_h = jnp.dot(e, v_g, preferred_element_type=jnp.float32)
                y_h = y_h * pl.reciprocal(denom, approx=False)

                contrib = jnp.dot(y_h, wo_ref[h * HEAD_DIM:(h + 1) * HEAD_DIM, :],
                                  preferred_element_type=jnp.float32)
                acc = contrib if acc is None else acc + contrib

        out_ref[r0:r0 + S, :DIM] = acc


# ----------------------------- one-time parameter prep ------------------------
def prepare_params(wq, wk, wv):
    """Hoisted out of the per-call path: fuse the three projection weights and
    fold the 1/sqrt(head_dim) score scale into the Q columns."""
    return jnp.concatenate([wq * INV_SCALE, wk, wv], axis=1)   # (DIM, QKV_WIDTH)


# ----------------------------- jitted forward ---------------------------------
@jax.jit
def llama_attention(hidden_states, w_qkv, wo_t, freqs_cos, freqs_sin, atten_mask):
    """Pallas implementation of LlamaAttention.forward (no kv-cache branch).

    hidden_states : (B, S, DIM) f32
    w_qkv         : (DIM, QKV_WIDTH) pre-fused/pre-scaled (prepare_params)
    wo_t          : (Q_WIDTH, DIM)   == torch wo.weight.T
    freqs_cos/sin : (S, HEAD_DIM // 2)
    atten_mask    : (B, S, S) additive mask
    Returns (y, k_list, v_list) matching the torch module
    (output_new_cache_only=False): k_list[i] is (B, HEAD_DIM, S) rotated K,
    v_list[i] is (B, S, HEAD_DIM).
    """
    x2d = hidden_states.reshape(B * S, DIM)     # contiguous -> free reshape

    slab = pl.pallas_call(
        _fused_attn_kernel,
        grid=(1,),                               # single step: batch fused in-kernel
        in_specs=[
            pl.BlockSpec((B * S, DIM), lambda i: (0, 0)),        # x
            pl.BlockSpec((DIM, QKV_WIDTH), lambda i: (0, 0)),    # fused QKV weight
            pl.BlockSpec((Q_WIDTH, DIM), lambda i: (0, 0)),      # wo
            pl.BlockSpec((S, HALF), lambda i: (0, 0)),           # cos
            pl.BlockSpec((S, HALF), lambda i: (0, 0)),           # sin
            pl.BlockSpec((B, S, S), lambda i: (0, 0, 0)),        # mask
        ],
        out_specs=pl.BlockSpec((B * S, OUT_WIDTH), lambda i: (0, 0)),
        out_shape=jax.ShapeDtypeStruct((B * S, OUT_WIDTH), jnp.float32),
        compiler_params=pltpu.CompilerParams(
            dimension_semantics=("arbitrary",)),  # 1 step; at production shapes
                                                  # keep a parallel batch/q-tile
                                                  # axis for v7x's 2 TCs.
    )(x2d, w_qkv, wo_t, freqs_cos, freqs_sin, atten_mask)

    slab = slab.reshape(B, S, OUT_WIDTH)
    y = slab[:, :, :DIM]
    k_cat = slab[:, :, K_OFF:K_OFF + KV_WIDTH]
    v_cat = slab[:, :, V_OFF:]

    # Cheap wrapper-side layout plumbing (torch: k.permute(0, 2, 3, 1)[:, i]).
    k_list = [jnp.transpose(k_cat[:, :, i * HEAD_DIM:(i + 1) * HEAD_DIM], (0, 2, 1))
              for i in range(N_KV_HEADS)]
    v_list = [v_cat[:, :, i * HEAD_DIM:(i + 1) * HEAD_DIM]
              for i in range(N_KV_HEADS)]
    return y, k_list, v_list


# ----------------------------- plain-JAX reference ----------------------------
def reference(x, wq, wk, wv, wo_t, cos, sin, mask):
    q = (x @ wq).reshape(B, S, N_HEADS, HEAD_DIM)
    k = (x @ wk).reshape(B, S, N_KV_HEADS, HEAD_DIM)
    v = (x @ wv).reshape(B, S, N_KV_HEADS, HEAD_DIM)

    def rope4(t):
        tr, ti = t[..., :HALF], t[..., HALF:]
        c = cos[None, :, None, :]
        s = sin[None, :, None, :]
        return jnp.concatenate([tr * c - ti * s, tr * s + ti * c], -1)

    q = rope4(q)
    k = jnp.transpose(rope4(k), (0, 2, 3, 1))            # (B, KV, hd, S)
    outs = []
    for h in range(N_HEADS):
        g = h // N_GROUPS
        attn = jnp.einsum('bsd,bdt->bst', q[:, :, h, :], k[:, g]) / SCALE + mask
        attn = jax.nn.softmax(attn, axis=-1)
        outs.append(jnp.einsum('bst,btd->bsd', attn, v[:, :, g, :]))
    y = jnp.concatenate(outs, axis=-1) @ wo_t
    k_list = [k[:, i] for i in range(N_KV_HEADS)]
    v_list = [v[:, :, i, :] for i in range(N_KV_HEADS)]
    return y, k_list, v_list


# ----------------------------- main --------------------------------------------
if __name__ == "__main__":
    key = jax.random.PRNGKey(0)
    k1, k2, k3, k4, k5 = jax.random.split(key, 5)

    hidden_states = jax.random.normal(k1, (B, S, DIM), jnp.float32)
    # Synthetic weights (torch Linear weight.T layouts).
    wq = jax.random.normal(k2, (DIM, N_HEADS * HEAD_DIM), jnp.float32) * 0.05
    wk = jax.random.normal(k3, (DIM, N_KV_HEADS * HEAD_DIM), jnp.float32) * 0.05
    wv = jax.random.normal(k4, (DIM, N_KV_HEADS * HEAD_DIM), jnp.float32) * 0.05
    wo_t = jax.random.normal(k5, (N_HEADS * HEAD_DIM, DIM), jnp.float32) * 0.05

    # Rotary tables (computed once, outside the jitted per-call path).
    inv_freq = 1.0 / (10000.0 ** (jnp.arange(HALF, dtype=jnp.float32) / HALF))
    pos = jnp.arange(S, dtype=jnp.float32)
    angles = pos[:, None] * inv_freq[None, :]            # (S, HALF)
    freqs_cos = jnp.cos(angles)
    freqs_sin = jnp.sin(angles)

    # Causal additive attention mask (B, S, S).
    causal = jnp.tril(jnp.ones((S, S), jnp.float32))
    atten_mask = jnp.where(causal == 1.0, 0.0, -1e9)
    atten_mask = jnp.broadcast_to(atten_mask, (B, S, S))

    # One-time weight fusion + scale folding (hoisted out of the hot path).
    w_qkv = prepare_params(wq, wk, wv)

    y, k_list, v_list = llama_attention(hidden_states, w_qkv, wo_t,
                                        freqs_cos, freqs_sin, atten_mask)
    jax.block_until_ready(y)

    y_ref, k_ref, v_ref = reference(hidden_states, wq, wk, wv, wo_t,
                                    freqs_cos, freqs_sin, atten_mask)
    assert jnp.allclose(y, y_ref, atol=1e-4, rtol=1e-4)
    for a, b_ in zip(k_list, k_ref):
        assert jnp.allclose(a, b_, atol=1e-4, rtol=1e-4)
    for a, b_ in zip(v_list, v_ref):
        assert jnp.allclose(a, b_, atol=1e-4, rtol=1e-4)

    print("KERNEL_OK")
</pallas_src>

<mosaic_0001>
module attributes {stable_mosaic.version = 11 : i64} {
  func.func @_fused_attn_kernel(%arg0: i32, %arg1: memref<16x32xf32, #tpu.memory_space<vmem>>, %arg2: memref<32x64xf32, #tpu.memory_space<vmem>>, %arg3: memref<32x32xf32, #tpu.memory_space<vmem>>, %arg4: memref<8x4xf32, #tpu.memory_space<vmem>>, %arg5: memref<8x4xf32, #tpu.memory_space<vmem>>, %arg6: memref<2x8x8xf32, #tpu.memory_space<vmem>>, %arg7: memref<16x64xf32, #tpu.memory_space<vmem>>) attributes {dimension_semantics = [#tpu.dimension_semantics<arbitrary>], iteration_bounds = array<i64: 1>, scalar_prefetch = 0 : i64, scratch_operands = 0 : i64, tpu.core_type = #tpu.core_type<tc>, window_params = [{pipeline_mode = #tpu.pipeline_mode<synchronous>, transform_indices = @transform_0, window_bounds = array<i64: 16, 32>}, {pipeline_mode = #tpu.pipeline_mode<synchronous>, transform_indices = @transform_1, window_bounds = array<i64: 32, 64>}, {pipeline_mode = #tpu.pipeline_mode<synchronous>, transform_indices = @transform_2, window_bounds = array<i64: 32, 32>}, {pipeline_mode = #tpu.pipeline_mode<synchronous>, transform_indices = @transform_3, window_bounds = array<i64: 8, 4>}, {pipeline_mode = #tpu.pipeline_mode<synchronous>, transform_indices = @transform_4, window_bounds = array<i64: 8, 4>}, {pipeline_mode = #tpu.pipeline_mode<synchronous>, transform_indices = @transform_5, window_bounds = array<i64: 2, 8, 8>}, {pipeline_mode = #tpu.pipeline_mode<synchronous>, transform_indices = @transform_6, window_bounds = array<i64: 16, 64>}]} {
    %c0 = arith.constant 0 : index
    %c0_0 = arith.constant 0 : index
    %0 = vector.load %arg1[%c0, %c0_0] : memref<16x32xf32, #tpu.memory_space<vmem>>, vector<16x32xf32>
    %c0_1 = arith.constant 0 : index
    %c0_2 = arith.constant 0 : index
    %1 = vector.load %arg2[%c0_1, %c0_2] : memref<32x64xf32, #tpu.memory_space<vmem>>, vector<32x64xf32>
    %cst = arith.constant dense<0.000000e+00> : vector<16x64xf32>
    %2 = tpu.matmul %0, %1, %cst {dimension_numbers = #tpu.dot_dimension_numbers<[1], [0], [0], [1], [0, 0, 1, 1], [], []>} : vector<16x32xf32>, vector<32x64xf32>, vector<16x64xf32> -> vector<16x64xf32>
    %c0_3 = arith.constant 0 : index
    %c0_4 = arith.constant 0 : index
    %3 = vector.load %arg4[%c0_3, %c0_4] : memref<8x4xf32, #tpu.memory_space<vmem>>, vector<8x4xf32>
    %c0_5 = arith.constant 0 : index
    %c0_6 = arith.constant 0 : index
    %4 = vector.load %arg5[%c0_5, %c0_6] : memref<8x4xf32, #tpu.memory_space<vmem>>, vector<8x4xf32>
    %5 = vector.extract_strided_slice %2 {offsets = [0, 48], sizes = [16, 16], strides = [1, 1]} : vector<16x64xf32> to vector<16x16xf32>
    %c0_7 = arith.constant 0 : index
    %c48 = arith.constant 48 : index
    %6 = vector.load %arg7[%c0_7, %c48] : memref<16x64xf32, #tpu.memory_space<vmem>>, vector<16x16xf32>
    tpu.vector_store %arg7[%c0_7, %c48], %5 {strides = array<i32>} : memref<16x64xf32, #tpu.memory_space<vmem>>, vector<16x16xf32>,
    %7 = vector.extract_strided_slice %2 {offsets = [0, 0], sizes = [8, 64], strides = [1, 1]} : vector<16x64xf32> to vector<8x64xf32>
    %c0_8 = arith.constant 0 : index
    %c0_9 = arith.constant 0 : index
    %c0_10 = arith.constant 0 : index
    %8 = vector.load %arg6[%c0_8, %c0_9, %c0_10] : memref<2x8x8xf32, #tpu.memory_space<vmem>>, vector<1x8x8xf32>
    %9 = vector.shape_cast %8 : vector<1x8x8xf32> to vector<8x8xf32>
    %10 = vector.extract_strided_slice %7 {offsets = [0, 32], sizes = [8, 4], strides = [1, 1]} : vector<8x64xf32> to vector<8x4xf32>
    %11 = vector.extract_strided_slice %7 {offsets = [0, 36], sizes = [8, 4], strides = [1, 1]} : vector<8x64xf32> to vector<8x4xf32>
    %12 = arith.mulf %10, %3 : vector<8x4xf32>
    %13 = arith.mulf %11, %4 : vector<8x4xf32>
    %14 = arith.subf %12, %13 : vector<8x4xf32>
    %15 = arith.mulf %10, %4 : vector<8x4xf32>
    %16 = arith.mulf %11, %3 : vector<8x4xf32>
    %17 = arith.addf %15, %16 : vector<8x4xf32>
    %c0_11 = arith.constant 0 : index
    %c32 = arith.constant 32 : index
    %18 = vector.load %arg7[%c0_11, %c32] : memref<16x64xf32, #tpu.memory_space<vmem>>, vector<8x4xf32>
    tpu.vector_store %arg7[%c0_11, %c32], %14 {strides = array<i32>} : memref<16x64xf32, #tpu.memory_space<vmem>>, vector<8x4xf32>,
    %c0_12 = arith.constant 0 : index
    %c36 = arith.constant 36 : index
    %19 = vector.load %arg7[%c0_12, %c36] : memref<16x64xf32, #tpu.memory_space<vmem>>, vector<8x4xf32>
    tpu.vector_store %arg7[%c0_12, %c36], %17 {strides = array<i32>} : memref<16x64xf32, #tpu.memory_space<vmem>>, vector<8x4xf32>,
    %20 = vector.extract_strided_slice %7 {offsets = [0, 48], sizes = [8, 8], strides = [1, 1]} : vector<8x64xf32> to vector<8x8xf32>
    %21 = vector.extract_strided_slice %7 {offsets = [0, 0], sizes = [8, 4], strides = [1, 1]} : vector<8x64xf32> to vector<8x4xf32>
    %22 = vector.extract_strided_slice %7 {offsets = [0, 4], sizes = [8, 4], strides = [1, 1]} : vector<8x64xf32> to vector<8x4xf32>
    %23 = arith.mulf %21, %3 : vector<8x4xf32>
    %24 = arith.mulf %22, %4 : vector<8x4xf32>
    %25 = arith.subf %23, %24 : vector<8x4xf32>
    %26 = arith.mulf %21, %4 : vector<8x4xf32>
    %27 = arith.mulf %22, %3 : vector<8x4xf32>
    %28 = arith.addf %26, %27 : vector<8x4xf32>
    %29 = tpu.transpose %14, [1, 0] : vector<8x4xf32> -> vector<4x8xf32>
    %cst_13 = arith.constant dense<0.000000e+00> : vector<8x8xf32>
    %30 = tpu.matmul %25, %29, %cst_13 {dimension_numbers = #tpu.dot_dimension_numbers<[1], [0], [0], [1], [0, 0, 1, 1], [], []>} : vector<8x4xf32>, vector<4x8xf32>, vector<8x8xf32> -> vector<8x8xf32>
    %31 = tpu.transpose %17, [1, 0] : vector<8x4xf32> -> vector<4x8xf32>
    %cst_14 = arith.constant dense<0.000000e+00> : vector<8x8xf32>
    %32 = tpu.matmul %28, %31, %cst_14 {dimension_numbers = #tpu.dot_dimension_numbers<[1], [0], [0], [1], [0, 0, 1, 1], [], []>} : vector<8x4xf32>, vector<4x8xf32>, vector<8x8xf32> -> vector<8x8xf32>
    %33 = arith.addf %30, %32 : vector<8x8xf32>
    %34 = arith.addf %33, %9 : vector<8x8xf32>
    %cst_15 = arith.constant dense<0xFF800000> : vector<8xf32>
    %35 = vector.multi_reduction <maximumf>, %34, %cst_15 [1] : vector<8x8xf32> to vector<8xf32>
    %36 = vector.shape_cast %35 : vector<8xf32> to vector<8x1xf32>
    %37 = vector.broadcast %36 : vector<8x1xf32> to vector<8x8xf32>
    %38 = arith.subf %34, %37 : vector<8x8xf32>
    %39 = math.exp %38 : vector<8x8xf32>
    %cst_16 = arith.constant dense<0.000000e+00> : vector<8xf32>
    %40 = vector.multi_reduction <add>, %39, %cst_16 [1] : vector<8x8xf32> to vector<8xf32>
    %41 = vector.shape_cast %40 : vector<8xf32> to vector<8x1xf32>
    %cst_17 = arith.constant dense<0.000000e+00> : vector<8x8xf32>
    %42 = tpu.matmul %39, %20, %cst_17 {dimension_numbers = #tpu.dot_dimension_numbers<[1], [0], [0], [1], [0, 0, 1, 1], [], []>} : vector<8x8xf32>, vector<8x8xf32>, vector<8x8xf32> -> vector<8x8xf32>
    %43 = tpu.reciprocal %41 : vector<8x1xf32> -> vector<8x1xf32>
    %44 = vector.broadcast %43 : vector<8x1xf32> to vector<8x8xf32>
    %45 = arith.mulf %42, %44 : vector<8x8xf32>
    %c0_18 = arith.constant 0 : index
    %c0_19 = arith.constant 0 : index
    %46 = vector.load %arg3[%c0_18, %c0_19] : memref<32x32xf32, #tpu.memory_space<vmem>>, vector<8x32xf32>
    %cst_20 = arith.constant dense<0.000000e+00> : vector<8x32xf32>
    %47 = tpu.matmul %45, %46, %cst_20 {dimension_numbers = #tpu.dot_dimension_numbers<[1], [0], [0], [1], [0, 0, 1, 1], [], []>} : vector<8x8xf32>, vector<8x32xf32>, vector<8x32xf32> -> vector<8x32xf32>
    %48 = vector.extract_strided_slice %7 {offsets = [0, 8], sizes = [8, 4], strides = [1, 1]} : vector<8x64xf32> to vector<8x4xf32>
    %49 = vector.extract_strided_slice %7 {offsets = [0, 12], sizes = [8, 4], strides = [1, 1]} : vector<8x64xf32> to vector<8x4xf32>
    %50 = arith.mulf %48, %3 : vector<8x4xf32>
    %51 = arith.mulf %49, %4 : vector<8x4xf32>
    %52 = arith.subf %50, %51 : vector<8x4xf32>
    %53 = arith.mulf %48, %4 : vector<8x4xf32>
    %54 = arith.mulf %49, %3 : vector<8x4xf32>
    %55 = arith.addf %53, %54 : vector<8x4xf32>
    %56 = tpu.transpose %14, [1, 0] : vector<8x4xf32> -> vector<4x8xf32>
    %cst_21 = arith.constant dense<0.000000e+00> : vector<8x8xf32>
    %57 = tpu.matmul %52, %56, %cst_21 {dimension_numbers = #tpu.dot_dimension_numbers<[1], [0], [0], [1], [0, 0, 1, 1], [], []>} : vector<8x4xf32>, vector<4x8xf32>, vector<8x8xf32> -> vector<8x8xf32>
    %58 = tpu.transpose %17, [1, 0] : vector<8x4xf32> -> vector<4x8xf32>
    %cst_22 = arith.constant dense<0.000000e+00> : vector<8x8xf32>
    %59 = tpu.matmul %55, %58, %cst_22 {dimension_numbers = #tpu.dot_dimension_numbers<[1], [0], [0], [1], [0, 0, 1, 1], [], []>} : vector<8x4xf32>, vector<4x8xf32>, vector<8x8xf32> -> vector<8x8xf32>
    %60 = arith.addf %57, %59 : vector<8x8xf32>
    %61 = arith.addf %60, %9 : vector<8x8xf32>
    %cst_23 = arith.constant dense<0xFF800000> : vector<8xf32>
    %62 = vector.multi_reduction <maximumf>, %61, %cst_23 [1] : vector<8x8xf32> to vector<8xf32>
    %63 = vector.shape_cast %62 : vector<8xf32> to vector<8x1xf32>
    %64 = vector.broadcast %63 : vector<8x1xf32> to vector<8x8xf32>
    %65 = arith.subf %61, %64 : vector<8x8xf32>
    %66 = math.exp %65 : vector<8x8xf32>
    %cst_24 = arith.constant dense<0.000000e+00> : vector<8xf32>
    %67 = vector.multi_reduction <add>, %66, %cst_24 [1] : vector<8x8xf32> to vector<8xf32>
    %68 = vector.shape_cast %67 : vector<8xf32> to vector<8x1xf32>
    %cst_25 = arith.constant dense<0.000000e+00> : vector<8x8xf32>
    %69 = tpu.matmul %66, %20, %cst_25 {dimension_numbers = #tpu.dot_dimension_numbers<[1], [0], [0], [1], [0, 0, 1, 1], [], []>} : vector<8x8xf32>, vector<8x8xf32>, vector<8x8xf32> -> vector<8x8xf32>
    %70 = tpu.reciprocal %68 : vector<8x1xf32> -> vector<8x1xf32>
    %71 = vector.broadcast %70 : vector<8x1xf32> to vector<8x8xf32>
    %72 = arith.mulf %69, %71 : vector<8x8xf32>
    %c8 = arith.constant 8 : index
    %c0_26 = arith.constant 0 : index
    %73 = vector.load %arg3[%c8, %c0_26] : memref<32x32xf32, #tpu.memory_space<vmem>>, vector<8x32xf32>
    %cst_27 = arith.constant dense<0.000000e+00> : vector<8x32xf32>
    %74 = tpu.matmul %72, %73, %cst_27 {dimension_numbers = #tpu.dot_dimension_numbers<[1], [0], [0], [1], [0, 0, 1, 1], [], []>} : vector<8x8xf32>, vector<8x32xf32>, vector<8x32xf32> -> vector<8x32xf32>
    %75 = arith.addf %47, %74 : vector<8x32xf32>
    %76 = vector.extract_strided_slice %7 {offsets = [0, 40], sizes = [8, 4], strides = [1, 1]} : vector<8x64xf32> to vector<8x4xf32>
    %77 = vector.extract_strided_slice %7 {offsets = [0, 44], sizes = [8, 4], strides = [1, 1]} : vector<8x64xf32> to vector<8x4xf32>
    %78 = arith.mulf %76, %3 : vector<8x4xf32>
    %79 = arith.mulf %77, %4 : vector<8x4xf32>
    %80 = arith.subf %78, %79 : vector<8x4xf32>
    %81 = arith.mulf %76, %4 : vector<8x4xf32>
    %82 = arith.mulf %77, %3 : vector<8x4xf32>
    %83 = arith.addf %81, %82 : vector<8x4xf32>
    %c0_28 = arith.constant 0 : index
    %c40 = arith.constant 40 : index
    %84 = vector.load %arg7[%c0_28, %c40] : memref<16x64xf32, #tpu.memory_space<vmem>>, vector<8x4xf32>
    tpu.vector_store %arg7[%c0_28, %c40], %80 {strides = array<i32>} : memref<16x64xf32, #tpu.memory_space<vmem>>, vector<8x4xf32>,
    %c0_29 = arith.constant 0 : index
    %c44 = arith.constant 44 : index
    %85 = vector.load %arg7[%c0_29, %c44] : memref<16x64xf32, #tpu.memory_space<vmem>>, vector<8x4xf32>
    tpu.vector_store %arg7[%c0_29, %c44], %83 {strides = array<i32>} : memref<16x64xf32, #tpu.memory_space<vmem>>, vector<8x4xf32>,
    %86 = vector.extract_strided_slice %7 {offsets = [0, 56], sizes = [8, 8], strides = [1, 1]} : vector<8x64xf32> to vector<8x8xf32>
    %87 = vector.extract_strided_slice %7 {offsets = [0, 16], sizes = [8, 4], strides = [1, 1]} : vector<8x64xf32> to vector<8x4xf32>
    %88 = vector.extract_strided_slice %7 {offsets = [0, 20], sizes = [8, 4], strides = [1, 1]} : vector<8x64xf32> to vector<8x4xf32>
    %89 = arith.mulf %87, %3 : vector<8x4xf32>
    %90 = arith.mulf %88, %4 : vector<8x4xf32>
    %91 = arith.subf %89, %90 : vector<8x4xf32>
    %92 = arith.mulf %87, %4 : vector<8x4xf32>
    %93 = arith.mulf %88, %3 : vector<8x4xf32>
    %94 = arith.addf %92, %93 : vector<8x4xf32>
    %95 = tpu.transpose %80, [1, 0] : vector<8x4xf32> -> vector<4x8xf32>
    %cst_30 = arith.constant dense<0.000000e+00> : vector<8x8xf32>
    %96 = tpu.matmul %91, %95, %cst_30 {dimension_numbers = #tpu.dot_dimension_numbers<[1], [0], [0], [1], [0, 0, 1, 1], [], []>} : vector<8x4xf32>, vector<4x8xf32>, vector<8x8xf32> -> vector<8x8xf32>
    %97 = tpu.transpose %83, [1, 0] : vector<8x4xf32> -> vector<4x8xf32>
    %cst_31 = arith.constant dense<0.000000e+00> : vector<8x8xf32>
    %98 = tpu.matmul %94, %97, %cst_31 {dimension_numbers = #tpu.dot_dimension_numbers<[1], [0], [0], [1], [0, 0, 1, 1], [], []>} : vector<8x4xf32>, vector<4x8xf32>, vector<8x8xf32> -> vector<8x8xf32>
    %99 = arith.addf %96, %98 : vector<8x8xf32>
    %100 = arith.addf %99, %9 : vector<8x8xf32>
    %cst_32 = arith.constant dense<0xFF800000> : vector<8xf32>
    %101 = vector.multi_reduction <maximumf>, %100, %cst_32 [1] : vector<8x8xf32> to vector<8xf32>
    %102 = vector.shape_cast %101 : vector<8xf32> to vector<8x1xf32>
    %103 = vector.broadcast %102 : vector<8x1xf32> to vector<8x8xf32>
    %104 = arith.subf %100, %103 : vector<8x8xf32>
    %105 = math.exp %104 : vector<8x8xf32>
    %cst_33 = arith.constant dense<0.000000e+00> : vector<8xf32>
    %106 = vector.multi_reduction <add>, %105, %cst_33 [1] : vector<8x8xf32> to vector<8xf32>
    %107 = vector.shape_cast %106 : vector<8xf32> to vector<8x1xf32>
    %cst_34 = arith.constant dense<0.000000e+00> : vector<8x8xf32>
    %108 = tpu.matmul %105, %86, %cst_34 {dimension_numbers = #tpu.dot_dimension_numbers<[1], [0], [0], [1], [0, 0, 1, 1], [], []>} : vector<8x8xf32>, vector<8x8xf32>, vector<8x8xf32> -> vector<8x8xf32>
    %109 = tpu.reciprocal %107 : vector<8x1xf32> -> vector<8x1xf32>
    %110 = vector.broadcast %109 : vector<8x1xf32> to vector<8x8xf32>
    %111 = arith.mulf %108, %110 : vector<8x8xf32>
    %c16 = arith.constant 16 : index
    %c0_35 = arith.constant 0 : index
    %112 = vector.load %arg3[%c16, %c0_35] : memref<32x32xf32, #tpu.memory_space<vmem>>, vector<8x32xf32>
    %cst_36 = arith.constant dense<0.000000e+00> : vector<8x32xf32>
    %113 = tpu.matmul %111, %112, %cst_36 {dimension_numbers = #tpu.dot_dimension_numbers<[1], [0], [0], [1], [0, 0, 1, 1], [], []>} : vector<8x8xf32>, vector<8x32xf32>, vector<8x32xf32> -> vector<8x32xf32>
    %114 = arith.addf %75, %113 : vector<8x32xf32>
    %115 = vector.extract_strided_slice %7 {offsets = [0, 24], sizes = [8, 4], strides = [1, 1]} : vector<8x64xf32> to vector<8x4xf32>
    %116 = vector.extract_strided_slice %7 {offsets = [0, 28], sizes = [8, 4], strides = [1, 1]} : vector<8x64xf32> to vector<8x4xf32>
    %117 = arith.mulf %115, %3 : vector<8x4xf32>
    %118 = arith.mulf %116, %4 : vector<8x4xf32>
    %119 = arith.subf %117, %118 : vector<8x4xf32>
    %120 = arith.mulf %115, %4 : vector<8x4xf32>
    %121 = arith.mulf %116, %3 : vector<8x4xf32>
    %122 = arith.addf %120, %121 : vector<8x4xf32>
    %123 = tpu.transpose %80, [1, 0] : vector<8x4xf32> -> vector<4x8xf32>
    %cst_37 = arith.constant dense<0.000000e+00> : vector<8x8xf32>
    %124 = tpu.matmul %119, %123, %cst_37 {dimension_numbers = #tpu.dot_dimension_numbers<[1], [0], [0], [1], [0, 0, 1, 1], [], []>} : vector<8x4xf32>, vector<4x8xf32>, vector<8x8xf32> -> vector<8x8xf32>
    %125 = tpu.transpose %83, [1, 0] : vector<8x4xf32> -> vector<4x8xf32>
    %cst_38 = arith.constant dense<0.000000e+00> : vector<8x8xf32>
    %126 = tpu.matmul %122, %125, %cst_38 {dimension_numbers = #tpu.dot_dimension_numbers<[1], [0], [0], [1], [0, 0, 1, 1], [], []>} : vector<8x4xf32>, vector<4x8xf32>, vector<8x8xf32> -> vector<8x8xf32>
    %127 = arith.addf %124, %126 : vector<8x8xf32>
    %128 = arith.addf %127, %9 : vector<8x8xf32>
    %cst_39 = arith.constant dense<0xFF800000> : vector<8xf32>
    %129 = vector.multi_reduction <maximumf>, %128, %cst_39 [1] : vector<8x8xf32> to vector<8xf32>
    %130 = vector.shape_cast %129 : vector<8xf32> to vector<8x1xf32>
    %131 = vector.broadcast %130 : vector<8x1xf32> to vector<8x8xf32>
    %132 = arith.subf %128, %131 : vector<8x8xf32>
    %133 = math.exp %132 : vector<8x8xf32>
    %cst_40 = arith.constant dense<0.000000e+00> : vector<8xf32>
    %134 = vector.multi_reduction <add>, %133, %cst_40 [1] : vector<8x8xf32> to vector<8xf32>
    %135 = vector.shape_cast %134 : vector<8xf32> to vector<8x1xf32>
    %cst_41 = arith.constant dense<0.000000e+00> : vector<8x8xf32>
    %136 = tpu.matmul %133, %86, %cst_41 {dimension_numbers = #tpu.dot_dimension_numbers<[1], [0], [0], [1], [0, 0, 1, 1], [], []>} : vector<8x8xf32>, vector<8x8xf32>, vector<8x8xf32> -> vector<8x8xf32>
    %137 = tpu.reciprocal %135 : vector<8x1xf32> -> vector<8x1xf32>
    %138 = vector.broadcast %137 : vector<8x1xf32> to vector<8x8xf32>
    %139 = arith.mulf %136, %138 : vector<8x8xf32>
    %c24 = arith.constant 24 : index
    %c0_42 = arith.constant 0 : index
    %140 = vector.load %arg3[%c24, %c0_42] : memref<32x32xf32, #tpu.memory_space<vmem>>, vector<8x32xf32>
    %cst_43 = arith.constant dense<0.000000e+00> : vector<8x32xf32>
    %141 = tpu.matmul %139, %140, %cst_43 {dimension_numbers = #tpu.dot_dimension_numbers<[1], [0], [0], [1], [0, 0, 1, 1], [], []>} : vector<8x8xf32>, vector<8x32xf32>, vector<8x32xf32> -> vector<8x32xf32>
    %142 = arith.addf %114, %141 : vector<8x32xf32>
    %c0_44 = arith.constant 0 : index
    %c0_45 = arith.constant 0 : index
    %143 = vector.load %arg7[%c0_44, %c0_45] : memref<16x64xf32, #tpu.memory_space<vmem>>, vector<8x32xf32>
    tpu.vector_store %arg7[%c0_44, %c0_45], %142 {strides = array<i32>} : memref<16x64xf32, #tpu.memory_space<vmem>>, vector<8x32xf32>,
    %144 = vector.extract_strided_slice %2 {offsets = [8, 0], sizes = [8, 64], strides = [1, 1]} : vector<16x64xf32> to vector<8x64xf32>
    %c1 = arith.constant 1 : index
    %c0_46 = arith.constant 0 : index
    %c0_47 = arith.constant 0 : index
    %145 = vector.load %arg6[%c1, %c0_46, %c0_47] : memref<2x8x8xf32, #tpu.memory_space<vmem>>, vector<1x8x8xf32>
    %146 = vector.shape_cast %145 : vector<1x8x8xf32> to vector<8x8xf32>
    %147 = vector.extract_strided_slice %144 {offsets = [0, 32], sizes = [8, 4], strides = [1, 1]} : vector<8x64xf32> to vector<8x4xf32>
    %148 = vector.extract_strided_slice %144 {offsets = [0, 36], sizes = [8, 4], strides = [1, 1]} : vector<8x64xf32> to vector<8x4xf32>
    %149 = arith.mulf %147, %3 : vector<8x4xf32>
    %150 = arith.mulf %148, %4 : vector<8x4xf32>
    %151 = arith.subf %149, %150 : vector<8x4xf32>
    %152 = arith.mulf %147, %4 : vector<8x4xf32>
    %153 = arith.mulf %148, %3 : vector<8x4xf32>
    %154 = arith.addf %152, %153 : vector<8x4xf32>
    %c8_48 = arith.constant 8 : index
    %c32_49 = arith.constant 32 : index
    %155 = vector.load %arg7[%c8_48, %c32_49] : memref<16x64xf32, #tpu.memory_space<vmem>>, vector<8x4xf32>
    tpu.vector_store %arg7[%c8_48, %c32_49], %151 {strides = array<i32>} : memref<16x64xf32, #tpu.memory_space<vmem>>, vector<8x4xf32>,
    %c8_50 = arith.constant 8 : index
    %c36_51 = arith.constant 36 : index
    %156 = vector.load %arg7[%c8_50, %c36_51] : memref<16x64xf32, #tpu.memory_space<vmem>>, vector<8x4xf32>
    tpu.vector_store %arg7[%c8_50, %c36_51], %154 {strides = array<i32>} : memref<16x64xf32, #tpu.memory_space<vmem>>, vector<8x4xf32>,
    %157 = vector.extract_strided_slice %144 {offsets = [0, 48], sizes = [8, 8], strides = [1, 1]} : vector<8x64xf32> to vector<8x8xf32>
    %158 = vector.extract_strided_slice %144 {offsets = [0, 0], sizes = [8, 4], strides = [1, 1]} : vector<8x64xf32> to vector<8x4xf32>
    %159 = vector.extract_strided_slice %144 {offsets = [0, 4], sizes = [8, 4], strides = [1, 1]} : vector<8x64xf32> to vector<8x4xf32>
    %160 = arith.mulf %158, %3 : vector<8x4xf32>
    %161 = arith.mulf %159, %4 : vector<8x4xf32>
    %162 = arith.subf %160, %161 : vector<8x4xf32>
    %163 = arith.mulf %158, %4 : vector<8x4xf32>
    %164 = arith.mulf %159, %3 : vector<8x4xf32>
    %165 = arith.addf %163, %164 : vector<8x4xf32>
    %166 = tpu.transpose %151, [1, 0] : vector<8x4xf32> -> vector<4x8xf32>
    %cst_52 = arith.constant dense<0.000000e+00> : vector<8x8xf32>
    %167 = tpu.matmul %162, %166, %cst_52 {dimension_numbers = #tpu.dot_dimension_numbers<[1], [0], [0], [1], [0, 0, 1, 1], [], []>} : vector<8x4xf32>, vector<4x8xf32>, vector<8x8xf32> -> vector<8x8xf32>
    %168 = tpu.transpose %154, [1, 0] : vector<8x4xf32> -> vector<4x8xf32>
    %cst_53 = arith.constant dense<0.000000e+00> : vector<8x8xf32>
    %169 = tpu.matmul %165, %168, %cst_53 {dimension_numbers = #tpu.dot_dimension_numbers<[1], [0], [0], [1], [0, 0, 1, 1], [], []>} : vector<8x4xf32>, vector<4x8xf32>, vector<8x8xf32> -> vector<8x8xf32>
    %170 = arith.addf %167, %169 : vector<8x8xf32>
    %171 = arith.addf %170, %146 : vector<8x8xf32>
    %cst_54 = arith.constant dense<0xFF800000> : vector<8xf32>
    %172 = vector.multi_reduction <maximumf>, %171, %cst_54 [1] : vector<8x8xf32> to vector<8xf32>
    %173 = vector.shape_cast %172 : vector<8xf32> to vector<8x1xf32>
    %174 = vector.broadcast %173 : vector<8x1xf32> to vector<8x8xf32>
    %175 = arith.subf %171, %174 : vector<8x8xf32>
    %176 = math.exp %175 : vector<8x8xf32>
    %cst_55 = arith.constant dense<0.000000e+00> : vector<8xf32>
    %177 = vector.multi_reduction <add>, %176, %cst_55 [1] : vector<8x8xf32> to vector<8xf32>
    %178 = vector.shape_cast %177 : vector<8xf32> to vector<8x1xf32>
    %cst_56 = arith.constant dense<0.000000e+00> : vector<8x8xf32>
    %179 = tpu.matmul %176, %157, %cst_56 {dimension_numbers = #tpu.dot_dimension_numbers<[1], [0], [0], [1], [0, 0, 1, 1], [], []>} : vector<8x8xf32>, vector<8x8xf32>, vector<8x8xf32> -> vector<8x8xf32>
    %180 = tpu.reciprocal %178 : vector<8x1xf32> -> vector<8x1xf32>
    %181 = vector.broadcast %180 : vector<8x1xf32> to vector<8x8xf32>
    %182 = arith.mulf %179, %181 : vector<8x8xf32>
    %c0_57 = arith.constant 0 : index
    %c0_58 = arith.constant 0 : index
    %183 = vector.load %arg3[%c0_57, %c0_58] : memref<32x32xf32, #tpu.memory_space<vmem>>, vector<8x32xf32>
    %cst_59 = arith.constant dense<0.000000e+00> : vector<8x32xf32>
    %184 = tpu.matmul %182, %183, %cst_59 {dimension_numbers = #tpu.dot_dimension_numbers<[1], [0], [0], [1], [0, 0, 1, 1], [], []>} : vector<8x8xf32>, vector<8x32xf32>, vector<8x32xf32> -> vector<8x32xf32>
    %185 = vector.extract_strided_slice %144 {offsets = [0, 8], sizes = [8, 4], strides = [1, 1]} : vector<8x64xf32> to vector<8x4xf32>
    %186 = vector.extract_strided_slice %144 {offsets = [0, 12], sizes = [8, 4], strides = [1, 1]} : vector<8x64xf32> to vector<8x4xf32>
    %187 = arith.mulf %185, %3 : vector<8x4xf32>
    %188 = arith.mulf %186, %4 : vector<8x4xf32>
    %189 = arith.subf %187, %188 : vector<8x4xf32>
    %190 = arith.mulf %185, %4 : vector<8x4xf32>
    %191 = arith.mulf %186, %3 : vector<8x4xf32>
    %192 = arith.addf %190, %191 : vector<8x4xf32>
    %193 = tpu.transpose %151, [1, 0] : vector<8x4xf32> -> vector<4x8xf32>
    %cst_60 = arith.constant dense<0.000000e+00> : vector<8x8xf32>
    %194 = tpu.matmul %189, %193, %cst_60 {dimension_numbers = #tpu.dot_dimension_numbers<[1], [0], [0], [1], [0, 0, 1, 1], [], []>} : vector<8x4xf32>, vector<4x8xf32>, vector<8x8xf32> -> vector<8x8xf32>
    %195 = tpu.transpose %154, [1, 0] : vector<8x4xf32> -> vector<4x8xf32>
    %cst_61 = arith.constant dense<0.000000e+00> : vector<8x8xf32>
    %196 = tpu.matmul %192, %195, %cst_61 {dimension_numbers = #tpu.dot_dimension_numbers<[1], [0], [0], [1], [0, 0, 1, 1], [], []>} : vector<8x4xf32>, vector<4x8xf32>, vector<8x8xf32> -> vector<8x8xf32>
    %197 = arith.addf %194, %196 : vector<8x8xf32>
    %198 = arith.addf %197, %146 : vector<8x8xf32>
    %cst_62 = arith.constant dense<0xFF800000> : vector<8xf32>
    %199 = vector.multi_reduction <maximumf>, %198, %cst_62 [1] : vector<8x8xf32> to vector<8xf32>
    %200 = vector.shape_cast %199 : vector<8xf32> to vector<8x1xf32>
    %201 = vector.broadcast %200 : vector<8x1xf32> to vector<8x8xf32>
    %202 = arith.subf %198, %201 : vector<8x8xf32>
    %203 = math.exp %202 : vector<8x8xf32>
    %cst_63 = arith.constant dense<0.000000e+00> : vector<8xf32>
    %204 = vector.multi_reduction <add>, %203, %cst_63 [1] : vector<8x8xf32> to vector<8xf32>
    %205 = vector.shape_cast %204 : vector<8xf32> to vector<8x1xf32>
    %cst_64 = arith.constant dense<0.000000e+00> : vector<8x8xf32>
    %206 = tpu.matmul %203, %157, %cst_64 {dimension_numbers = #tpu.dot_dimension_numbers<[1], [0], [0], [1], [0, 0, 1, 1], [], []>} : vector<8x8xf32>, vector<8x8xf32>, vector<8x8xf32> -> vector<8x8xf32>
    %207 = tpu.reciprocal %205 : vector<8x1xf32> -> vector<8x1xf32>
    %208 = vector.broadcast %207 : vector<8x1xf32> to vector<8x8xf32>
    %209 = arith.mulf %206, %208 : vector<8x8xf32>
    %c8_65 = arith.constant 8 : index
    %c0_66 = arith.constant 0 : index
    %210 = vector.load %arg3[%c8_65, %c0_66] : memref<32x32xf32, #tpu.memory_space<vmem>>, vector<8x32xf32>
    %cst_67 = arith.constant dense<0.000000e+00> : vector<8x32xf32>
    %211 = tpu.matmul %209, %210, %cst_67 {dimension_numbers = #tpu.dot_dimension_numbers<[1], [0], [0], [1], [0, 0, 1, 1], [], []>} : vector<8x8xf32>, vector<8x32xf32>, vector<8x32xf32> -> vector<8x32xf32>
    %212 = arith.addf %184, %211 : vector<8x32xf32>
    %213 = vector.extract_strided_slice %144 {offsets = [0, 40], sizes = [8, 4], strides = [1, 1]} : vector<8x64xf32> to vector<8x4xf32>
    %214 = vector.extract_strided_slice %144 {offsets = [0, 44], sizes = [8, 4], strides = [1, 1]} : vector<8x64xf32> to vector<8x4xf32>
    %215 = arith.mulf %213, %3 : vector<8x4xf32>
    %216 = arith.mulf %214, %4 : vector<8x4xf32>
    %217 = arith.subf %215, %216 : vector<8x4xf32>
    %218 = arith.mulf %213, %4 : vector<8x4xf32>
    %219 = arith.mulf %214, %3 : vector<8x4xf32>
    %220 = arith.addf %218, %219 : vector<8x4xf32>
    %c8_68 = arith.constant 8 : index
    %c40_69 = arith.constant 40 : index
    %221 = vector.load %arg7[%c8_68, %c40_69] : memref<16x64xf32, #tpu.memory_space<vmem>>, vector<8x4xf32>
    tpu.vector_store %arg7[%c8_68, %c40_69], %217 {strides = array<i32>} : memref<16x64xf32, #tpu.memory_space<vmem>>, vector<8x4xf32>,
    %c8_70 = arith.constant 8 : index
    %c44_71 = arith.constant 44 : index
    %222 = vector.load %arg7[%c8_70, %c44_71] : memref<16x64xf32, #tpu.memory_space<vmem>>, vector<8x4xf32>
    tpu.vector_store %arg7[%c8_70, %c44_71], %220 {strides = array<i32>} : memref<16x64xf32, #tpu.memory_space<vmem>>, vector<8x4xf32>,
    %223 = vector.extract_strided_slice %144 {offsets = [0, 56], sizes = [8, 8], strides = [1, 1]} : vector<8x64xf32> to vector<8x8xf32>
    %224 = vector.extract_strided_slice %144 {offsets = [0, 16], sizes = [8, 4], strides = [1, 1]} : vector<8x64xf32> to vector<8x4xf32>
    %225 = vector.extract_strided_slice %144 {offsets = [0, 20], sizes = [8, 4], strides = [1, 1]} : vector<8x64xf32> to vector<8x4xf32>
    %226 = arith.mulf %224, %3 : vector<8x4xf32>
    %227 = arith.mulf %225, %4 : vector<8x4xf32>
    %228 = arith.subf %226, %227 : vector<8x4xf32>
    %229 = arith.mulf %224, %4 : vector<8x4xf32>
    %230 = arith.mulf %225, %3 : vector<8x4xf32>
    %231 = arith.addf %229, %230 : vector<8x4xf32>
    %232 = tpu.transpose %217, [1, 0] : vector<8x4xf32> -> vector<4x8xf32>
    %cst_72 = arith.constant dense<0.000000e+00> : vector<8x8xf32>
    %233 = tpu.matmul %228, %232, %cst_72 {dimension_numbers = #tpu.dot_dimension_numbers<[1], [0], [0], [1], [0, 0, 1, 1], [], []>} : vector<8x4xf32>, vector<4x8xf32>, vector<8x8xf32> -> vector<8x8xf32>
    %234 = tpu.transpose %220, [1, 0] : vector<8x4xf32> -> vector<4x8xf32>
    %cst_73 = arith.constant dense<0.000000e+00> : vector<8x8xf32>
    %235 = tpu.matmul %231, %234, %cst_73 {dimension_numbers = #tpu.dot_dimension_numbers<[1], [0], [0], [1], [0, 0, 1, 1], [], []>} : vector<8x4xf32>, vector<4x8xf32>, vector<8x8xf32> -> vector<8x8xf32>
    %236 = arith.addf %233, %235 : vector<8x8xf32>
    %237 = arith.addf %236, %146 : vector<8x8xf32>
    %cst_74 = arith.constant dense<0xFF800000> : vector<8xf32>
    %238 = vector.multi_reduction <maximumf>, %237, %cst_74 [1] : vector<8x8xf32> to vector<8xf32>
    %239 = vector.shape_cast %238 : vector<8xf32> to vector<8x1xf32>
    %240 = vector.broadcast %239 : vector<8x1xf32> to vector<8x8xf32>
    %241 = arith.subf %237, %240 : vector<8x8xf32>
    %242 = math.exp %241 : vector<8x8xf32>
    %cst_75 = arith.constant dense<0.000000e+00> : vector<8xf32>
    %243 = vector.multi_reduction <add>, %242, %cst_75 [1] : vector<8x8xf32> to vector<8xf32>
    %244 = vector.shape_cast %243 : vector<8xf32> to vector<8x1xf32>
    %cst_76 = arith.constant dense<0.000000e+00> : vector<8x8xf32>
    %245 = tpu.matmul %242, %223, %cst_76 {dimension_numbers = #tpu.dot_dimension_numbers<[1], [0], [0], [1], [0, 0, 1, 1], [], []>} : vector<8x8xf32>, vector<8x8xf32>, vector<8x8xf32> -> vector<8x8xf32>
    %246 = tpu.reciprocal %244 : vector<8x1xf32> -> vector<8x1xf32>
    %247 = vector.broadcast %246 : vector<8x1xf32> to vector<8x8xf32>
    %248 = arith.mulf %245, %247 : vector<8x8xf32>
    %c16_77 = arith.constant 16 : index
    %c0_78 = arith.constant 0 : index
    %249 = vector.load %arg3[%c16_77, %c0_78] : memref<32x32xf32, #tpu.memory_space<vmem>>, vector<8x32xf32>
    %cst_79 = arith.constant dense<0.000000e+00> : vector<8x32xf32>
    %250 = tpu.matmul %248, %249, %cst_79 {dimension_numbers = #tpu.dot_dimension_numbers<[1], [0], [0], [1], [0, 0, 1, 1], [], []>} : vector<8x8xf32>, vector<8x32xf32>, vector<8x32xf32> -> vector<8x32xf32>
    %251 = arith.addf %212, %250 : vector<8x32xf32>
    %252 = vector.extract_strided_slice %144 {offsets = [0, 24], sizes = [8, 4], strides = [1, 1]} : vector<8x64xf32> to vector<8x4xf32>
    %253 = vector.extract_strided_slice %144 {offsets = [0, 28], sizes = [8, 4], strides = [1, 1]} : vector<8x64xf32> to vector<8x4xf32>
    %254 = arith.mulf %252, %3 : vector<8x4xf32>
    %255 = arith.mulf %253, %4 : vector<8x4xf32>
    %256 = arith.subf %254, %255 : vector<8x4xf32>
    %257 = arith.mulf %252, %4 : vector<8x4xf32>
    %258 = arith.mulf %253, %3 : vector<8x4xf32>
    %259 = arith.addf %257, %258 : vector<8x4xf32>
    %260 = tpu.transpose %217, [1, 0] : vector<8x4xf32> -> vector<4x8xf32>
    %cst_80 = arith.constant dense<0.000000e+00> : vector<8x8xf32>
    %261 = tpu.matmul %256, %260, %cst_80 {dimension_numbers = #tpu.dot_dimension_numbers<[1], [0], [0], [1], [0, 0, 1, 1], [], []>} : vector<8x4xf32>, vector<4x8xf32>, vector<8x8xf32> -> vector<8x8xf32>
    %262 = tpu.transpose %220, [1, 0] : vector<8x4xf32> -> vector<4x8xf32>
    %cst_81 = arith.constant dense<0.000000e+00> : vector<8x8xf32>
    %263 = tpu.matmul %259, %262, %cst_81 {dimension_numbers = #tpu.dot_dimension_numbers<[1], [0], [0], [1], [0, 0, 1, 1], [], []>} : vector<8x4xf32>, vector<4x8xf32>, vector<8x8xf32> -> vector<8x8xf32>
    %264 = arith.addf %261, %263 : vector<8x8xf32>
    %265 = arith.addf %264, %146 : vector<8x8xf32>
    %cst_82 = arith.constant dense<0xFF800000> : vector<8xf32>
    %266 = vector.multi_reduction <maximumf>, %265, %cst_82 [1] : vector<8x8xf32> to vector<8xf32>
    %267 = vector.shape_cast %266 : vector<8xf32> to vector<8x1xf32>
    %268 = vector.broadcast %267 : vector<8x1xf32> to vector<8x8xf32>
    %269 = arith.subf %265, %268 : vector<8x8xf32>
    %270 = math.exp %269 : vector<8x8xf32>
    %cst_83 = arith.constant dense<0.000000e+00> : vector<8xf32>
    %271 = vector.multi_reduction <add>, %270, %cst_83 [1] : vector<8x8xf32> to vector<8xf32>
    %272 = vector.shape_cast %271 : vector<8xf32> to vector<8x1xf32>
    %cst_84 = arith.constant dense<0.000000e+00> : vector<8x8xf32>
    %273 = tpu.matmul %270, %223, %cst_84 {dimension_numbers = #tpu.dot_dimension_numbers<[1], [0], [0], [1], [0, 0, 1, 1], [], []>} : vector<8x8xf32>, vector<8x8xf32>, vector<8x8xf32> -> vector<8x8xf32>
    %274 = tpu.reciprocal %272 : vector<8x1xf32> -> vector<8x1xf32>
    %275 = vector.broadcast %274 : vector<8x1xf32> to vector<8x8xf32>
    %276 = arith.mulf %273, %275 : vector<8x8xf32>
    %c24_85 = arith.constant 24 : index
    %c0_86 = arith.constant 0 : index
    %277 = vector.load %arg3[%c24_85, %c0_86] : memref<32x32xf32, #tpu.memory_space<vmem>>, vector<8x32xf32>
    %cst_87 = arith.constant dense<0.000000e+00> : vector<8x32xf32>
    %278 = tpu.matmul %276, %277, %cst_87 {dimension_numbers = #tpu.dot_dimension_numbers<[1], [0], [0], [1], [0, 0, 1, 1], [], []>} : vector<8x8xf32>, vector<8x32xf32>, vector<8x32xf32> -> vector<8x32xf32>
    %279 = arith.addf %251, %278 : vector<8x32xf32>
    %c8_88 = arith.constant 8 : index
    %c0_89 = arith.constant 0 : index
    %280 = vector.load %arg7[%c8_88, %c0_89] : memref<16x64xf32, #tpu.memory_space<vmem>>, vector<8x32xf32>
    tpu.vector_store %arg7[%c8_88, %c0_89], %279 {strides = array<i32>} : memref<16x64xf32, #tpu.memory_space<vmem>>, vector<8x32xf32>,
    return
  }
  func.func @transform_0(%arg0: i32) -> (i32, i32) {
    %c0_i32 = arith.constant 0 : i32
    %c0_i32_0 = arith.constant 0 : i32
    %c0_i32_1 = arith.constant 0 : i32
    return %c0_i32, %c0_i32_0 : i32, i32
  }
  func.func @transform_1(%arg0: i32) -> (i32, i32) {
    %c0_i32 = arith.constant 0 : i32
    %c0_i32_0 = arith.constant 0 : i32
    %c0_i32_1 = arith.constant 0 : i32
    return %c0_i32, %c0_i32_0 : i32, i32
  }
  func.func @transform_2(%arg0: i32) -> (i32, i32) {
    %c0_i32 = arith.constant 0 : i32
    %c0_i32_0 = arith.constant 0 : i32
    %c0_i32_1 = arith.constant 0 : i32
    return %c0_i32, %c0_i32_0 : i32, i32
  }
  func.func @transform_3(%arg0: i32) -> (i32, i32) {
    %c0_i32 = arith.constant 0 : i32
    %c0_i32_0 = arith.constant 0 : i32
    %c0_i32_1 = arith.constant 0 : i32
    return %c0_i32, %c0_i32_0 : i32, i32
  }
  func.func @transform_4(%arg0: i32) -> (i32, i32) {
    %c0_i32 = arith.constant 0 : i32
    %c0_i32_0 = arith.constant 0 : i32
    %c0_i32_1 = arith.constant 0 : i32
    return %c0_i32, %c0_i32_0 : i32, i32
  }
  func.func @transform_5(%arg0: i32) -> (i32, i32, i32) {
    %c0_i32 = arith.constant 0 : i32
    %c0_i32_0 = arith.constant 0 : i32
    %c0_i32_1 = arith.constant 0 : i32
    %c0_i32_2 = arith.constant 0 : i32
    return %c0_i32, %c0_i32_0, %c0_i32_1 : i32, i32, i32
  }
  func.func @transform_6(%arg0: i32) -> (i32, i32) {
    %c0_i32 = arith.constant 0 : i32
    %c0_i32_0 = arith.constant 0 : i32
    %c0_i32_1 = arith.constant 0 : i32
    return %c0_i32, %c0_i32_0 : i32, i32
  }
}

</mosaic_0001>

<bundles_post_ra>
// kernel: llama_attention.1
= control target key start
LH: loop header
LB: loop body
LE: loop exit
PB: predicated region body
PF: predicated region fallthrough
CT: control target
= control target key end

     0   :  { %11 = vsyncpa [#allocation3], 0  ;;  %s2083_s0 = inlined_call_operand.vmem [shape: f32[16,32], index: 0, kind: input, shape index: {}]   ;;  %s2084_s1 = inlined_call_operand.hbm [shape: f32[32,64], index: 1, kind: input, shape index: {}]   ;;  %s2085_s2 = inlined_call_operand.hbm [shape: f32[32,32], index: 2, kind: input, shape index: {}]   ;;  %s2086_s3 = inlined_call_operand.vmem [shape: f32[8,4], index: 3, kind: input, shape index: {}]   ;;  %s2087_s4 = inlined_call_operand.vmem [shape: f32[8,4], index: 4, kind: input, shape index: {}]   ;;  %s2088_s5 = inlined_call_operand.hbm [shape: f32[2,8,8], index: 5, kind: input, shape index: {}]   ;;  %s2089_s6 = inlined_call_operand.vmem [shape: f32[16,64], index: 6, kind: output, shape index: {}]  }
   0x1   :  { %12 = vsyncpa [#allocation5], 0  ;;  %s32_s23 = sshll.u32 %s2085_s2, 4  ;;  %s1591_s24 = smov [#allocation4]   ;;  %s33_s23 = int_to_ptr.hbm [resolvable:$true] %s32_s23 }
   0x2   :  { %s34_s25 = sshll.u32 %s1591_s24, 4  ;;  %s19_s28 = sshll.u32 %s2084_s1, 4  ;;  %s35_s25 = int_to_ptr.vmem [resolvable:$true] %s34_s25  ;;  %s20_s28 = int_to_ptr.hbm [resolvable:$true] %s19_s28 }
   0x3   :  { %s1592_s29 = smov 128   ;;  %s1593_s30 = smov 8  }
   0x4   :  { %40 = dma.hbm_to_vmem [thread:$0]  %s33_s23, 512, %s35_s25, [#allocation5], %s1592_s29, %s1592_s29, %s1593_s30  }
   0x5   :  { %s1594_s7 = smov [#allocation2]   ;;  %s49_s11 = sshll.u32 %s2088_s5, 4  ;;  %s50_s11 = int_to_ptr.hbm [resolvable:$true] %s49_s11 }
   0x6   :  { %s21_s8 = sshll.u32 %s1594_s7, 4  ;;  %s1595_s2 = smov [#allocation6]   ;;  %s22_s8 = int_to_ptr.vmem [resolvable:$true] %s21_s8 }
   0x7   :  { %27 = dma.hbm_to_vmem [thread:$0]  %s20_s28, 512, %s22_s8, [#allocation3], %s1592_s29, %s1592_s29, %s1593_s30  }
   0x8   :  { %s51_s12 = sshll.u32 %s1595_s2, 4  ;;  %s52_s12 = int_to_ptr.vmem [resolvable:$true] %s51_s12 }
   0x9   :  { %57 = dma.hbm_to_vmem [thread:$0]  %s50_s11, 256, %s52_s12, [#allocation5], %s1592_s29, %s1592_s29, %s1593_s30  }
   0xa   :  { %1587 = dma.done.wait [#allocation3], 512  }
   0xb   :  { %1588 = vsyncadd [#allocation3], 4294966784 }
   0xc   :  { %1589 = dma.done.wait [#allocation5], 768  }
   0xd   :  { %1590 = vsyncadd [#allocation5], 4294966528  ;;  %v75_v0 = vld [vmem:[#allocation2 + $0x18] sm:$0xff]  ;;  %v74_v1 = vld [vmem:[#allocation2 + $0x10] sm:$0xff]  ;;  %s1596_s5 = smov 36   ;;  %s1597_s16 = smov 4  }
   0xe   :  { %95 = vmatpush.msra.mxu0 %v75_v0  ;;  %v1664_v2 = vld [vmem:[%s2087_s4] sm:$0xff]  ;;  %v73_v3 = vld [vmem:[#allocation2 + $0x8] sm:$0xff]  ;;  %s1598_s17 = smov 32   ;;  %vm76_vm0 = vcmask 261120   ;;  %vm108_vm1 = vcmask 523648   ;;  %s1600_s24 = smov 12  }
   0xf   :  { %118 = vrot.lane.b32.xlu0 %v1664_v2, %s1596_s5  ;;  %v1670_v4 = vld [vmem:[%s2086_s3] sm:$0xff]  ;;  %149 = vrot.lane.b32.xlu2 %v1664_v2, %s1597_s16  ;;  %v71_v7 = vld [vmem:[%s2083_s0 + $0x8] sm:$0xff]  ;;  %vm140_vm2 = vcmask 294144   ;;  %s1601_s25 = smov 96   ;;  %s1602_s28 = smov 80   ;;  %vm170_vm3 = vcmask 31744  }
  0x10   :  { %96 = vmatpush.msra.mxu0 %v74_v1  ;;  %113 = vrot.lane.b32.xlu1 %v1670_v4, %s1598_s17  ;;  %v72_v5 = vld [vmem:[#allocation2] sm:$0xff]  ;;  %s1603_s29 = smov 120   ;;  %s1605_s7 = smov 28   ;;  %vm225_vm4 = vcmask 64512  }
  0x11   :  { %v70_v6 = vld [vmem:[%s2083_s0] sm:$0xff]  ;;  %s1599_s0 = smov 124   ;;  %s1606_s8 = smov 40  }
  0x12   :  { %97 = vmatpush.msra.mxu0 %v73_v3  ;;  %s1607_s9 = smov 16   ;;  %s1608_s10 = smov 20   ;;  %v1789_v53 = vld [vmem:[#allocation6] sm:$0xff] }
  0x13   :  { %s1609_s11 = smov 24   ;;  %s1610_s2 = smov 88  }
  0x14   :  { %98 = vmatpush.msra.mxu0 %v72_v5  ;;  %s1611_s12 = smov 112   ;;  %s1612_s1 = smov 104  }
  0x15   :  { %1410 = vmatmul.msk.f32.vlgmr.msra.gmra.mxu0 %vm76_vm0, %v70_v6  ;;  %s1613_s13 = smov 72  }
  0x17   :  { %131 = vrot.lane.b32.xlu0 %v1670_v4, %s1596_s5  ;;  %127 = vrot.lane.b32.xlu2 %v1664_v2, %s1598_s17 }
  0x1d   :  { %1411 = vmatmul.msk.f32.gmra.mxu0 %vm76_vm0, %v71_v7 }
  0x69   :  { %v1701_v13 = vpop.permute.xlu2 %149 }
  0x71   :  { %v1717_v17 = vpop.permute.xlu2 %127 }
  0x81   :  { %v1685_v8 = vpop.permute.xlu0 %118 }
  0x82   :  { %v1715_v16 = vpop.permute.xlu1 %113 }
  0x89   :  { %v1687_v9 = vpop.permute.xlu0 %131 }
  0x92   :  { %v1689_v10 = vpop.f32.mrf.mxu0 }
  0x93   :  { %v134_v11 = vmul.f32 %v1687_v9, %v1689_v10  ;;  %v121_v12 = vmul.f32 %v1685_v8, %v1689_v10  ;;  %109 = vst.msk [vmem:[%s2089_s6] sm:$0xff] %vm108_vm1, %v1689_v10  ;;  %v152_v15 = vmul.f32 %v1701_v13, %v1689_v10  ;;  %v130_v18 = vmul.f32 %v1717_v17, %v1689_v10 }
  0x94   :  { %v116_v19 = vmul.f32 %v1715_v16, %v1689_v10  ;;  %v148_v29 = vmul.f32 %v1670_v4, %v1689_v10  ;;  %v158_v33 = vmul.f32 %v1664_v2, %v1689_v10 }
  0x95   :  { %136 = vrot.lane.b32.xlu0 %v134_v11, %s1599_s0  ;;  %123 = vrot.lane.b32.xlu1 %v121_v12, %s1599_s0 }
  0x9a   :  { %v1703_v14 = vpop.f32.mrf.mxu0 }
  0x9b   :  { %110 = vst.msk [vmem:[%s2089_s6 + $0x8] sm:$0xff] %vm108_vm1, %v1703_v14 }
  0x9d   :  { %154 = vrot.lane.b32.xlu0 %v152_v15, %s1599_s0  ;;  %159 = vrot.lane.b32.xlu1 %v1670_v4, %s1597_s16 }
  0xa5   :  { %295 = vrot.lane.b32.xlu0 %v1670_v4, %s1600_s24 }
 0x107   :  { %v137_v20 = vpop.permute.xlu0 %136  ;;  %v124_v21 = vpop.permute.xlu1 %123 }
 0x108   :  { %v1723_v22 = vadd.f32 %v137_v20, %v130_v18  ;;  %v126_v23 = vsub.f32 %v116_v19, %v124_v21 }
 0x10a   :  { %168 = vrot.lane.b32.xlu1 %v1723_v22, %s1601_s25  ;;  %197 = vrot.lane.b32.xlu2 %v126_v23, %s1601_s25  ;;  %141 = vst.msk [vmem:[%s2089_s6] sm:$0xff] %vm140_vm2, %v126_v23 }
 0x10f   :  { %v155_v24 = vpop.permute.xlu0 %154  ;;  %v1732_v25 = vpop.permute.xlu1 %159 }
 0x110   :  { %v162_v26 = vmul.f32 %v1732_v25, %v1689_v10  ;;  %v157_v31 = vsub.f32 %v148_v29, %v155_v24 }
 0x112   :  { %282 = vrot.lane.b32.xlu1 %v1664_v2, %s1600_s24  ;;  %164 = vrot.lane.b32.xlu2 %v162_v26, %s1599_s0 }
 0x117   :  { %v1738_v27 = vpop.permute.xlu0 %295 }
 0x118   :  { %v298_v28 = vmul.f32 %v1738_v27, %v1689_v10 }
 0x11a   :  { %300 = vrot.lane.b32.xlu0 %v298_v28, %s1599_s0  ;;  %278 = vrot.lane.b32.xlu1 %v1670_v4, %s1593_s30 }
 0x11b   :  { %291 = vrot.lane.b32.xlu2 %v1664_v2, %s1593_s30  ;;  %s1604_s30 = smov 44  }
 0x122   :  { %236 = vrot.lane.b32.xlu1 %v1689_v10, %s1602_s28 }
 0x164   :  { %v198_v30 = vpop.permute.xlu2 %197 }
 0x165   :  { %1414 = vmatpush.xpose.msk.msra.mxu2 %vm170_vm3, %v198_v30 }
 0x168   :  { %1415 = vmatmul.msk.f32.vlgmr.msra.gmra.mxu2 %vm170_vm3, %v157_v31 }
 0x16c   :  { %v165_v32 = vpop.permute.xlu2 %164 }
 0x16d   :  { %v167_v35 = vadd.f32 %v165_v32, %v158_v33 }
 0x175   :  { %v1763_v38 = vpop.permute.xlu2 %291 }
 0x176   :  { %v294_v39 = vmul.f32 %v1763_v38, %v1689_v10 }
 0x17c   :  { %v169_v34 = vpop.permute.xlu1 %168 }
 0x17d   :  { %1412 = vmatpush.xpose.msk.msra.mxu1 %vm170_vm3, %v169_v34 }
 0x180   :  { %1413 = vmatmul.msk.f32.vlgmr.msra.gmra.mxu1 %vm170_vm3, %v167_v35 }
 0x181   :  { %1419 = vmatpush.xpose.msk.msrb.mxu1 %vm170_vm3, %v198_v30 }
 0x184   :  { %v1758_v36 = vpop.permute.xlu1 %282 }
 0x185   :  { %v285_v37 = vmul.f32 %v1758_v36, %v1689_v10 }
 0x187   :  { %287 = vrot.lane.b32.xlu2 %v285_v37, %s1599_s0 }
 0x18c   :  { %v301_v40 = vpop.permute.xlu0 %300  ;;  %v1767_v41 = vpop.permute.xlu1 %278 }
 0x18d   :  { %v303_v42 = vadd.f32 %v301_v40, %v294_v39  ;;  %v281_v44 = vmul.f32 %v1767_v41, %v1689_v10 }
 0x18f   :  { %305 = vrot.lane.b32.xlu2 %v303_v42, %s1603_s29 }
 0x194   :  { %v237_v43 = vpop.permute.xlu1 %236 }
 0x195   :  { %257 = vmatpush.msra.mxu3 %v237_v43  ;;  %382 = vmatpush.msrb.mxu2 %v237_v43 }
 0x197   :  { %1417 = vmatpush.xpose.msk.msrb.mxu3 %vm170_vm3, %v169_v34  ;;  %466 = vrot.lane.b32.xlu2 %v1670_v4, %s1604_s30 }
 0x19f   :  { %453 = vrot.lane.b32.xlu2 %v1664_v2, %s1604_s30 }
 0x1a7   :  { %661 = vrot.lane.b32.xlu2 %v1670_v4, %s1605_s7 }
 0x1af   :  { %462 = vrot.lane.b32.xlu2 %v1664_v2, %s1606_s8 }
 0x1b7   :  { %496 = vrot.lane.b32.xlu2 %v1664_v2, %s1607_s9 }
 0x1e1   :  { %v288_v45 = vpop.permute.xlu2 %287 }
 0x1e2   :  { %v290_v46 = vsub.f32 %v281_v44, %v288_v45 }
 0x1e4   :  { %330 = vrot.lane.b32.xlu1 %v290_v46, %s1603_s29 }
 0x1e9   :  { %v306_v47 = vpop.permute.xlu2 %305 }
 0x1eb   :  { %v221_v51 = vpop.f32.mrf.mxu2 }
 0x1ec   :  { %500 = vrot.lane.b32.xlu1 %v1670_v4, %s1608_s10 }
 0x1f1   :  { %v1780_v48 = vpop.permute.xlu2 %466 }
 0x1f2   :  { %v469_v56 = vmul.f32 %v1780_v48, %v1689_v10 }
 0x1f4   :  { %487 = vrot.lane.b32.xlu1 %v1664_v2, %s1608_s10 }
 0x1f9   :  { %v1783_v49 = vpop.permute.xlu2 %453 }
 0x1fa   :  { %v456_v50 = vmul.f32 %v1783_v49, %v1689_v10 }
 0x1fc   :  { %648 = vrot.lane.b32.xlu1 %v1664_v2, %s1605_s7  ;;  %458 = vrot.lane.b32.xlu2 %v456_v50, %s1599_s0 }
 0x1fd   :  { %v193_v52 = vpop.f32.mrf.mxu1 }
 0x1fe   :  { %v222_v54 = vadd.f32 %v221_v51, %v193_v52 }
 0x200   :  { %v224_v55 = vadd.f32 %v222_v54, %v1789_v53 }
 0x201   :  { %v1798_v58 = vpop.permute.xlu2 %661 }
 0x202   :  { %v226_v57 = vsel %vm225_vm4, %v224_v55, -inf  ;;  %v664_v59 = vmul.f32 %v1798_v58, %v1689_v10 }
 0x203   :  { %227 = vmax.xlane.f32.xlu0 %v226_v57 }
 0x204   :  { %471 = vrot.lane.b32.xlu1 %v469_v56, %s1599_s0 }
 0x209   :  { %v1815_v1 = vpop.permute.xlu2 %462 }
 0x20a   :  { %v465_v6 = vmul.f32 %v1815_v1, %v1689_v10 }
 0x20c   :  { %449 = vrot.lane.b32.xlu1 %v1670_v4, %s1606_s8 }
 0x211   :  { %v1827_v18 = vpop.permute.xlu2 %496 }
 0x212   :  { %v499_v30 = vmul.f32 %v1827_v18, %v1689_v10 }
 0x214   :  { %483 = vrot.lane.b32.xlu1 %v1670_v4, %s1607_s9 }
 0x21c   :  { %666 = vrot.lane.b32.xlu1 %v664_v59, %s1599_s0 }
 0x256   :  { %v331_v60 = vpop.permute.xlu1 %330  ;;  %v459_v23 = vpop.permute.xlu2 %458 }
 0x257   :  { %1420 = vmatmul.msk.f32.vlgmr.msrb.gmra.mxu1 %vm170_vm3, %v331_v60 }
 0x25e   :  { %v1804_v61 = vpop.permute.xlu1 %500 }
 0x25f   :  { %v503_v62 = vmul.f32 %v1804_v61, %v1689_v10 }
 0x261   :  { %505 = vrot.lane.b32.xlu0 %v503_v62, %s1599_s0 }
 0x266   :  { %v1809_v63 = vpop.permute.xlu1 %487 }
 0x267   :  { %v490_v0 = vmul.f32 %v1809_v63, %v1689_v10 }
 0x269   :  { %657 = vrot.lane.b32.xlu0 %v1664_v2, %s1609_s11  ;;  %492 = vrot.lane.b32.xlu2 %v490_v0, %s1599_s0 }
 0x26e   :  { %v1817_v3 = vpop.permute.xlu1 %648 }
 0x26f   :  { %v651_v5 = vmul.f32 %v1817_v3, %v1689_v10 }
 0x271   :  { %653 = vrot.lane.b32.xlu0 %v651_v5, %s1599_s0  ;;  %644 = vrot.lane.b32.xlu2 %v1670_v4, %s1609_s11 }
 0x276   :  { %v228_v7 = vpop.xlane.xlu0 %227  ;;  %v472_v11 = vpop.permute.xlu1 %471 }
 0x277   :  { %v229_v12 = vsub.f32 %v224_v55, %v228_v7  ;;  %v1825_v15 = vadd.f32 %v472_v11, %v465_v6 }
 0x279   :  { %v230_v19 = vmul.f32 1.442695, %v229_v12  ;;  %512 = vrot.lane.b32.xlu2 %v1825_v15, %s1610_s2  ;;  %v804_v12 = vmul.f32 %v1687_v9, %v1703_v14 }
 0x27b   :  { %1483 = vpow2.f32 %v230_v19  ;;  %v946_v19 = vmul.f32 %v1738_v27, %v1703_v14 }
 0x27e   :  { %v1831_v20 = vpop.permute.xlu1 %449 }
 0x27f   :  { %v452_v21 = vmul.f32 %v1831_v20, %v1689_v10 }
 0x281   :  { %v1835_v24 = vpop.eup %1483  ;;  %v1837_v26 = vsub.f32 %v452_v21, %v459_v23  ;;  %v1882_v21 = vld [vmem:[#allocation4 + $0x8] sm:$0xff] }
 0x282   :  { %1416 = vmatmul.msk.f32.vlgmr.msra.gmra.mxu3 %vm225_vm4, %v1835_v24 }
 0x283   :  { %542 = vrot.lane.b32.xlu2 %v1837_v26, %s1610_s2  ;;  %421 = vmatpush.msra.mxu3 %v1882_v21 }
 0x286   :  { %v1848_v31 = vpop.permute.xlu1 %483 }
 0x287   :  { %v486_v35 = vmul.f32 %v1848_v31, %v1689_v10 }
 0x28a   :  { %1418 = vmatmul.msk.f32.vlgmr.msrb.gmra.mxu3 %vm170_vm3, %v306_v47 }
 0x28e   :  { %v667_v42 = vpop.permute.xlu1 %666 }
 0x2c3   :  { %v493_v28 = vpop.permute.xlu2 %492 }
 0x2c4   :  { %v495_v39 = vsub.f32 %v486_v35, %v493_v28 }
 0x2cb   :  { %v1844_v29 = vpop.permute.xlu2 %644 }
 0x2cc   :  { %v647_v45 = vmul.f32 %v1844_v29, %v1689_v10 }
 0x2d3   :  { %v506_v32 = vpop.permute.xlu0 %505  ;;  %v513_v33 = vpop.permute.xlu2 %512 }
 0x2d4   :  { %v508_v34 = vadd.f32 %v506_v32, %v499_v30  ;;  %1424 = vmatpush.xpose.msk.msra.mxu2 %vm170_vm3, %v513_v33  ;;  %v351_v51 = vpop.f32.mrf.mxu1 }
 0x2d6   :  { %510 = vrot.lane.b32.xlu0 %v508_v34, %s1611_s12 }
 0x2db   :  { %v1854_v37 = vpop.permute.xlu0 %657 }
 0x2dc   :  { %v660_v40 = vmul.f32 %v1854_v37, %v1689_v10 }
 0x2dd   :  { %v543_v43 = vpop.permute.xlu2 %542 }
 0x2de   :  { %v669_v44 = vadd.f32 %v667_v42, %v660_v40  ;;  %539 = vrot.lane.b32.xlu0 %v495_v39, %s1611_s12  ;;  %1426 = vmatpush.xpose.msk.msrb.mxu0 %vm170_vm3, %v543_v43 }
 0x2e0   :  { %671 = vrot.lane.b32.xlu2 %v669_v44, %s1612_s1 }
 0x2e2   :  { %1432 = vmatpush.xpose.msk.msra.mxu0 %vm170_vm3, %v543_v43 }
 0x2e3   :  { %v654_v46 = vpop.permute.xlu0 %653 }
 0x2e4   :  { %v656_v47 = vsub.f32 %v647_v45, %v654_v46 }
 0x2e6   :  { %696 = vrot.lane.b32.xlu0 %v656_v47, %s1612_s1 }
 0x305   :  { %v1865_v50 = vpop.f32.mrf.mxu3 }
 0x30d   :  { %v326_v52 = vpop.f32.mrf.mxu3 }
 0x30e   :  { %v352_v54 = vadd.f32 %v351_v51, %v326_v52 }
 0x310   :  { %v354_v55 = vadd.f32 %v352_v54, %v1789_v53 }
 0x312   :  { %v355_v56 = vsel %vm225_vm4, %v354_v55, -inf }
 0x313   :  { %356 = vmax.xlane.f32.xlu1 %v355_v56 }
 0x33a   :  { %v672_v11 = vpop.permute.xlu2 %671 }
 0x348   :  { %v511_v57 = vpop.permute.xlu0 %510 }
 0x350   :  { %v540_v59 = vpop.permute.xlu0 %539 }
 0x351   :  { %1427 = vmatmul.msk.f32.vlgmr.msrb.gmra.mxu0 %vm170_vm3, %v540_v59  ;;  %v797_v59 = vmul.f32 %v1685_v8, %v1703_v14 }
 0x358   :  { %v697_v60 = vpop.permute.xlu0 %696 }
 0x359   :  { %1433 = vmatmul.msk.f32.vlgmr.msra.gmra.mxu0 %vm170_vm3, %v697_v60  ;;  %v824_v60 = vmul.f32 %v1732_v25, %v1703_v14 }
 0x386   :  { %v357_v62 = vpop.xlane.xlu1 %356 }
 0x387   :  { %v358_v0 = vsub.f32 %v354_v55, %v357_v62  ;;  %v232_v62 = vsel %vm225_vm4, %v1835_v24, 0.0 }
 0x389   :  { %v359_v5 = vmul.f32 1.442695, %v358_v0  ;;  %v803_v0 = vmul.f32 %v1717_v17, %v1703_v14  ;;  %v796_v17 = vmul.f32 %v1715_v16, %v1703_v14  ;;  %v938_v16 = vmul.f32 %v1767_v41, %v1703_v14 }
 0x38a   :  { %v1098_v41 = vmul.f32 %v1783_v49, %v1703_v14  ;;  %v1947_v49 = vld [vmem:[#allocation4] sm:$0xff] }
 0x38b   :  { %1485 = vpow2.f32 %v359_v5  ;;  %444 = vmatpush.msra.mxu1 %v1947_v49 }
 0x391   :  { %v1486_v6 = vpop.eup %1485 }
 0x392   :  { %1421 = vmatmul.msk.f32.vlgmr.msrb.gmra.mxu2 %vm225_vm4, %v1486_v6  ;;  %v361_v7 = vsel %vm225_vm4, %v1486_v6, 0.0 }
 0x393   :  { %1430 = vmatpush.xpose.msk.msrb.mxu2 %vm170_vm3, %v513_v33  ;;  %362 = vadd.xlane.f32.xlu2 %v361_v7 }
 0x39a   :  { %1425 = vmatmul.msk.f32.vlgmr.msra.gmra.mxu2 %vm170_vm3, %v511_v57 }
 0x3a2   :  { %1431 = vmatmul.msk.f32.vlgmr.msrb.gmra.mxu2 %vm170_vm3, %v672_v11 }
 0x3ab   :  { %806 = vrot.lane.b32.xlu2 %v804_v12, %s1599_s0 }
 0x3b3   :  { %948 = vrot.lane.b32.xlu2 %v946_v19, %s1599_s0 }
 0x3ce   :  { %v565_v44 = vpop.f32.mrf.mxu0 }
 0x3d6   :  { %v717_v52 = vpop.f32.mrf.mxu0 }
 0x406   :  { %v363_v23 = vpop.xlane.xlu2 %362 }
 0x407   :  { %1487 = vrcp.f32 %v363_v23  ;;  %v398_v33 = vand.u32 2147483648, %v363_v23  ;;  %v396_v9 = vand.u32 2147483647, %v363_v23  ;;  %vm392_vm6 = vweird.f32 %v363_v23 }
 0x409   :  { %v399_v27 = vor.u32 1.1754944e-38, %v398_v33  ;;  %vm397_vm8 = vcmp.eq.f32.partialorder %v396_v9, 8.507059e+37  ;;  %v945_v33 = vmul.f32 %v1763_v38, %v1703_v14  ;;  %v1274_v38 = vmul.f32 %v1798_v58, %v1703_v14 }
 0x40d   :  { %v1488_v28 = vpop.eup %1487 }
 0x40e   :  { %v388_v30 = vmul.f32 %v1488_v28, %v363_v23  ;;  %vm393_vm5 = vweird.f32 %v1488_v28  ;;  %v807_v8 = vpop.permute.xlu2 %806 }
 0x40f   :  { %vm394_vm7 = vmor %vm392_vm6, %vm393_vm5  ;;  %v1905_v25 = vadd.f32 %v807_v8, %v803_v0 }
 0x410   :  { %v389_v32 = vsub.f32 1.0, %v388_v30 }
 0x412   :  { %v390_v34 = vmul.f32 %v1488_v28, %v389_v32 }
 0x414   :  { %v391_v35 = vadd.f32 %v1488_v28, %v390_v34 }
 0x415   :  { %v384_v39 = vpop.f32.mrf.mxu2 }
 0x416   :  { %v395_v40 = vsel %vm394_vm7, %v1488_v28, %v391_v35  ;;  %v949_v32 = vpop.permute.xlu2 %948  ;;  %v1125_v35 = vmul.f32 %v1804_v61, %v1703_v14  ;;  %v817_v61 = vmul.f32 %v1701_v13, %v1703_v14 }
 0x417   :  { %v400_v42 = vsel %vm397_vm8, %v399_v27, %v395_v40  ;;  %v951_v34 = vadd.f32 %v949_v32, %v945_v33  ;;  %v1105_v40 = vmul.f32 %v1780_v48, %v1703_v14  ;;  %v1267_v48 = vmul.f32 %v1817_v3, %v1703_v14 }
 0x418   :  { %v401_v43 = vmul.f32 %v400_v42, %v384_v39  ;;  %v1118_v42 = vmul.f32 %v1809_v63, %v1703_v14 }
 0x41a   :  { %1422 = vmatmul.msk.f32.vlgmr.msra.gmra.mxu3 %vm225_vm4, %v401_v43 }
 0x41d   :  { %v535_v45 = vpop.f32.mrf.mxu2 }
 0x41e   :  { %v566_v46 = vadd.f32 %v565_v44, %v535_v45 }
 0x420   :  { %v568_v47 = vadd.f32 %v566_v46, %v1789_v53 }
 0x422   :  { %v569_v51 = vsel %vm225_vm4, %v568_v47, -inf }
 0x423   :  { %570 = vmax.xlane.f32.xlu0 %v569_v51 }
 0x425   :  { %v692_v54 = vpop.f32.mrf.mxu2 }
 0x426   :  { %v718_v55 = vadd.f32 %v717_v52, %v692_v54 }
 0x428   :  { %v720_v56 = vadd.f32 %v718_v55, %v1789_v53  ;;  %v939_v53 = vmul.f32 %v1758_v36, %v1703_v14 }
 0x42a   :  { %v721_v57 = vsel %vm225_vm4, %v720_v56, -inf }
 0x42b   :  { %722 = vmax.xlane.f32.xlu1 %v721_v57 }
 0x437   :  { %799 = vrot.lane.b32.xlu0 %v797_v59, %s1599_s0 }
 0x43f   :  { %826 = vrot.lane.b32.xlu0 %v824_v60, %s1599_s0 }
 0x444   :  { %578 = vrot.lane.b32.xlu1 %v1689_v10, %s1613_s13 }
 0x44c   :  { %941 = vrot.lane.b32.xlu1 %v939_v53, %s1599_s0  ;;  %v1958_v53 = vld [vmem:[#allocation4 + $0x10] sm:$0xff] }
 0x44d   :  { %638 = vmatpush.msrb.mxu1 %v1958_v53 }
 0x476   :  { %233 = vadd.xlane.f32.xlu1 %v232_v62  ;;  %v1960_v62 = vld [vmem:[#allocation4 + $0x18] sm:$0xff] }
 0x48f   :  { %830 = vrot.lane.b32.xlu1 %v1905_v25, %s1601_s25 }
 0x496   :  { %v571_v5 = vpop.xlane.xlu0 %570 }
 0x497   :  { %v572_v10 = vsub.f32 %v568_v47, %v571_v5 }
 0x499   :  { %v573_v6 = vmul.f32 1.442695, %v572_v10 }
 0x49b   :  { %1489 = vpow2.f32 %v573_v6 }
 0x49e   :  { %v723_v36 = vpop.xlane.xlu1 %722 }
 0x49f   :  { %v724_v7 = vsub.f32 %v720_v56, %v723_v36  ;;  %v823_v56 = vmul.f32 %v1664_v2, %v1703_v14 }
 0x4a1   :  { %v1490_v11 = vpop.eup %1489  ;;  %v725_v12 = vmul.f32 1.442695, %v724_v7  ;;  %v1124_v7 = vmul.f32 %v1827_v18, %v1703_v14 }
 0x4a2   :  { %v575_v24 = vsel %vm225_vm4, %v1490_v11, 0.0 }
 0x4a3   :  { %1491 = vpow2.f32 %v725_v12  ;;  %576 = vadd.xlane.f32.xlu0 %v575_v24 }
 0x4a9   :  { %v1492_v19 = vpop.eup %1491  ;;  %v800_v23 = vpop.permute.xlu0 %799 }
 0x4aa   :  { %v802_v28 = vsub.f32 %v796_v17, %v800_v23  ;;  %v727_v30 = vsel %vm225_vm4, %v1492_v19, 0.0 }
 0x4ab   :  { %728 = vadd.xlane.f32.xlu2 %v727_v30 }
 0x4ac   :  { %810 = vst.msk [vmem:[%s2089_s6 + $0x8] sm:$0xff] %vm140_vm2, %v802_v28 }
 0x4b1   :  { %v827_v55 = vpop.permute.xlu0 %826 }
 0x4b2   :  { %v829_v59 = vadd.f32 %v827_v55, %v823_v56 }
 0x4b6   :  { %v579_v9 = vpop.permute.xlu1 %578 }
 0x4b7   :  { %599 = vmatpush.msrb.mxu3 %v579_v9  ;;  %953 = vrot.lane.b32.xlu0 %v951_v34, %s1603_s29 }
 0x4b8   :  { %1428 = vmatmul.msk.f32.vlgmr.msrb.gmra.mxu3 %vm225_vm4, %v1490_v11 }
 0x4b9   :  { %748 = vmatpush.msra.mxu3 %v579_v9 }
 0x4be   :  { %v942_v39 = vpop.permute.xlu1 %941 }
 0x4bf   :  { %v944_v27 = vsub.f32 %v938_v16, %v942_v39  ;;  %1127 = vrot.lane.b32.xlu0 %v1125_v35, %s1599_s0  ;;  %v1104_v39 = vmul.f32 %v1815_v1, %v1703_v14  ;;  %v816_v1 = vmul.f32 %v1670_v4, %v1703_v14 }
 0x4c0   :  { %1434 = vmatmul.msk.f32.vlgmr.msra.gmra.mxu3 %vm225_vm4, %v1492_v19  ;;  %v1970_v19 = vpop.f32.mrf.mxu3 }
 0x4c1   :  { %978 = vrot.lane.b32.xlu1 %v944_v27, %s1603_s29 }
 0x4c3   :  { %858 = vrot.lane.b32.xlu2 %v802_v28, %s1601_s25 }
 0x4c7   :  { %1276 = vrot.lane.b32.xlu0 %v1274_v38, %s1599_s0 }
 0x4c9   :  { %1107 = vrot.lane.b32.xlu1 %v1105_v40, %s1599_s0 }
 0x4cb   :  { %1100 = vrot.lane.b32.xlu2 %v1098_v41, %s1599_s0 }
 0x4cf   :  { %819 = vrot.lane.b32.xlu0 %v817_v61, %s1599_s0 }
 0x4d1   :  { %1120 = vrot.lane.b32.xlu1 %v1118_v42, %s1599_s0 }
 0x4d3   :  { %1269 = vrot.lane.b32.xlu2 %v1267_v48, %s1599_s0 }
 0x4db   :  { %896 = vrot.lane.b32.xlu2 %v1703_v14, %s1602_s28 }
 0x4e9   :  { %v234_v13 = vpop.xlane.xlu1 %233 }
 0x4ea   :  { %1493 = vrcp.f32 %v234_v13  ;;  %v273_v44 = vand.u32 2147483648, %v234_v13  ;;  %v271_v3 = vand.u32 2147483647, %v234_v13  ;;  %vm267_vm10 = vweird.f32 %v234_v13 }
 0x4ec   :  { %v274_v47 = vor.u32 1.1754944e-38, %v273_v44  ;;  %vm272_vm12 = vcmp.eq.f32.partialorder %v271_v3, 8.507059e+37  ;;  %v1117_v3 = vmul.f32 %v1848_v31, %v1703_v14  ;;  %v1266_v31 = vmul.f32 %v1844_v29, %v1703_v14 }
 0x4f0   :  { %v1494_v58 = vpop.eup %1493 }
 0x4f1   :  { %v263_v63 = vmul.f32 %v1494_v58, %v234_v13  ;;  %vm268_vm9 = vweird.f32 %v1494_v58 }
 0x4f2   :  { %vm269_vm11 = vmor %vm267_vm10, %vm268_vm9  ;;  %vm146_vm9 = vcmask 326944  }
 0x4f3   :  { %v264_v43 = vsub.f32 1.0, %v263_v63 }
 0x4f5   :  { %v265_v45 = vmul.f32 %v1494_v58, %v264_v43 }
 0x4f7   :  { %v266_v46 = vadd.f32 %v1494_v58, %v265_v45  ;;  %v1097_v45 = vmul.f32 %v1831_v20, %v1703_v14  ;;  %v1273_v20 = vmul.f32 %v1854_v37, %v1703_v14 }
 0x4f9   :  { %v270_v51 = vsel %vm269_vm11, %v1494_v58, %v266_v46  ;;  %vm475_vm11 = vcmask 359744  }
 0x4fa   :  { %v275_v52 = vsel %vm272_vm12, %v274_v47, %v270_v51 }
 0x4fb   :  { %v276_v54 = vmul.f32 %v275_v52, %v1865_v50 }
 0x4fd   :  { %1423 = vmatmul.msk.f32.vlgmr.msra.gmra.mxu1 %vm225_vm4, %v276_v54 }
 0x4fe   :  { %787 = vmatpush.msra.mxu1 %v1960_v62 }
 0x501   :  { %v831_v57 = vpop.permute.xlu1 %830 }
 0x502   :  { %1436 = vmatpush.xpose.msk.msra.mxu2 %vm170_vm3, %v831_v57 }
 0x505   :  { %1437 = vmatmul.msk.f32.vlgmr.msra.gmra.mxu2 %vm170_vm3, %v829_v59 }
 0x516   :  { %v577_v60 = vpop.xlane.xlu0 %576 }
 0x517   :  { %1495 = vrcp.f32 %v577_v60  ;;  %v615_v32 = vand.u32 2147483648, %v577_v60  ;;  %vm609_vm14 = vweird.f32 %v577_v60  ;;  %v613_v34 = vand.u32 2147483647, %v577_v60 }
 0x519   :  { %v616_v35 = vor.u32 1.1754944e-38, %v615_v32  ;;  %vm614_vm1 = vcmp.eq.f32.partialorder %v613_v34, 8.507059e+37 }
 0x51d   :  { %v1496_v8 = vpop.eup %1495 }
 0x51e   :  { %v729_v50 = vpop.xlane.xlu2 %728  ;;  %v605_v2 = vmul.f32 %v1496_v8, %v577_v60  ;;  %vm610_vm13 = vweird.f32 %v1496_v8 }
 0x51f   :  { %1497 = vrcp.f32 %v729_v50  ;;  %vm611_vm15 = vmor %vm609_vm14, %vm610_vm13  ;;  %v764_v48 = vand.u32 2147483648, %v729_v50  ;;  %vm758_vm5 = vweird.f32 %v729_v50  ;;  %v762_v58 = vand.u32 2147483647, %v729_v50 }
 0x520   :  { %v606_v10 = vsub.f32 1.0, %v605_v2 }
 0x521   :  { %v765_v44 = vor.u32 1.1754944e-38, %v764_v48  ;;  %vm763_vm7 = vcmp.eq.f32.partialorder %v762_v58, 8.507059e+37 }
 0x522   :  { %v607_v12 = vmul.f32 %v1496_v8, %v606_v10 }
 0x524   :  { %v608_v30 = vadd.f32 %v1496_v8, %v607_v12 }
 0x525   :  { %v1498_v6 = vpop.eup %1497 }
 0x526   :  { %v859_v0 = vpop.permute.xlu2 %858  ;;  %v754_v11 = vmul.f32 %v1498_v6, %v729_v50  ;;  %v612_v18 = vsel %vm611_vm15, %v1496_v8, %v608_v30  ;;  %vm759_vm2 = vweird.f32 %v1498_v6 }
 0x527   :  { %1438 = vmatpush.xpose.msk.msrb.mxu0 %vm170_vm3, %v859_v0  ;;  %1443 = vmatpush.xpose.msk.msrb.mxu2 %vm170_vm3, %v859_v0  ;;  %v617_v40 = vsel %vm614_vm1, %v616_v35, %v612_v18  ;;  %vm760_vm6 = vmor %vm758_vm5, %vm759_vm2  ;;  %vm481_vm2 = vcmask 392544  }
 0x528   :  { %v755_v28 = vsub.f32 1.0, %v754_v11 }
 0x529   :  { %v1966_v5 = vpop.permute.xlu0 %953 }
 0x52a   :  { %v756_v9 = vmul.f32 %v1498_v6, %v755_v28 }
 0x52c   :  { %v757_v42 = vadd.f32 %v1498_v6, %v756_v9 }
 0x52e   :  { %v1101_v36 = vpop.permute.xlu2 %1100  ;;  %v761_v63 = vsel %vm760_vm6, %v1498_v6, %v757_v42 }
 0x52f   :  { %v766_v52 = vsel %vm763_vm7, %v765_v44, %v761_v63  ;;  %v1989_v54 = vsub.f32 %v1097_v45, %v1101_v36 }
 0x531   :  { %v1128_v24 = vpop.permute.xlu0 %1127 }
 0x532   :  { %v1130_v17 = vadd.f32 %v1128_v24, %v1124_v7 }
 0x533   :  { %v979_v23 = vpop.permute.xlu1 %978 }
 0x534   :  { %1444 = vmatmul.msk.f32.vlgmr.msrb.gmra.mxu2 %vm170_vm3, %v979_v23  ;;  %1132 = vrot.lane.b32.xlu2 %v1130_v17, %s1611_s12 }
 0x536   :  { %v1270_v33 = vpop.permute.xlu2 %1269 }
 0x537   :  { %v1272_v56 = vsub.f32 %v1266_v31, %v1270_v33 }
 0x539   :  { %v1277_v16 = vpop.permute.xlu0 %1276 }
 0x53b   :  { %v1108_v27 = vpop.permute.xlu1 %1107  ;;  %v601_v38 = vpop.f32.mrf.mxu3 }
 0x53c   :  { %v1976_v41 = vadd.f32 %v1108_v27, %v1104_v39  ;;  %v618_v61 = vmul.f32 %v617_v40, %v601_v38 }
 0x53e   :  { %1134 = vrot.lane.b32.xlu0 %v1976_v41, %s1610_s2  ;;  %v897_v13 = vpop.permute.xlu2 %896  ;;  %1429 = vmatmul.msk.f32.vlgmr.msrb.gmra.mxu1 %vm225_vm4, %v618_v61 }
 0x53f   :  { %1441 = vmatpush.xpose.msk.msrb.mxu1 %vm170_vm3, %v831_v57  ;;  %917 = vmatpush.msrb.mxu3 %v897_v13 }
 0x540   :  { %1030 = vmatpush.msra.mxu0 %v897_v13 }
 0x541   :  { %1069 = vmatpush.msra.mxu3 %v1882_v21  ;;  %v820_v43 = vpop.permute.xlu0 %819  ;;  %v1279_v21 = vadd.f32 %v1277_v16, %v1273_v20 }
 0x542   :  { %v822_v46 = vsub.f32 %v816_v1, %v820_v43 }
 0x543   :  { %v1121_v47 = vpop.permute.xlu1 %1120  ;;  %v750_v51 = vpop.f32.mrf.mxu3 }
 0x544   :  { %v1123_v55 = vsub.f32 %v1117_v3, %v1121_v47  ;;  %v767_v4 = vmul.f32 %v766_v52, %v750_v51  ;;  %1439 = vmatmul.msk.f32.vlgmr.msrb.gmra.mxu0 %vm170_vm3, %v822_v46 }
 0x546   :  { %1164 = vrot.lane.b32.xlu0 %v1989_v54, %s1610_s2  ;;  %1435 = vmatmul.msk.f32.vlgmr.msra.gmra.mxu1 %vm225_vm4, %v767_v4 }
 0x547   :  { %1161 = vrot.lane.b32.xlu2 %v1123_v55, %s1611_s12  ;;  %1092 = vmatpush.msra.mxu1 %v1947_v49 }
 0x54e   :  { %1442 = vmatmul.msk.f32.vlgmr.msrb.gmra.mxu1 %vm170_vm3, %v1966_v5  ;;  %1281 = vrot.lane.b32.xlu0 %v1279_v21, %s1612_s1 }
 0x54f   :  { %1306 = vrot.lane.b32.xlu2 %v1272_v56, %s1612_s1  ;;  %1260 = vmatpush.msrb.mxu1 %v1958_v53  ;;  %v2012_v53 = vld [vmem:[#allocation6 + $0x8] sm:$0xff] }
 0x57a   :  { %v446_v57 = vpop.f32.mrf.mxu1 }
 0x57b   :  { %v447_v49 = vadd.f32 %v446_v57, %v1970_v19 }
 0x588   :  { %v854_v0 = vpop.f32.mrf.mxu2 }
 0x58e   :  { %v1133_v29 = vpop.permute.xlu2 %1132 }
 0x5a1   :  { %v1162_v35 = vpop.permute.xlu2 %1161 }
 0x5a9   :  { %v1307_v27 = vpop.permute.xlu2 %1306 }
 0x5b0   :  { %v1135_v59 = vpop.permute.xlu0 %1134 }
 0x5b1   :  { %1448 = vmatpush.xpose.msk.msra.mxu2 %vm170_vm3, %v1135_v59 }
 0x5b4   :  { %1449 = vmatmul.msk.f32.vlgmr.msra.gmra.mxu2 %vm170_vm3, %v1133_v29 }
 0x5b5   :  { %1454 = vmatpush.xpose.msk.msrb.mxu2 %vm170_vm3, %v1135_v59 }
 0x5b7   :  { %v999_v11 = vpop.f32.mrf.mxu2 }
 0x5b8   :  { %v1165_v37 = vpop.permute.xlu0 %1164 }
 0x5b9   :  { %1450 = vmatpush.xpose.msk.msrb.mxu0 %vm170_vm3, %v1165_v37 }
 0x5bb   :  { %v640_v60 = vpop.f32.mrf.mxu1 }
 0x5bc   :  { %v643_v50 = vadd.f32 %v640_v60, %v447_v49 }
 0x5c0   :  { %v1282_v8 = vpop.permute.xlu0 %1281 }
 0x5c1   :  { %v882_v2 = vpop.f32.mrf.mxu0  ;;  %1455 = vmatmul.msk.f32.vlgmr.msrb.gmra.mxu2 %vm170_vm3, %v1282_v8 }
 0x5c2   :  { %v883_v5 = vadd.f32 %v882_v2, %v854_v0 }
 0x5c3   :  { %v789_v10 = vpop.f32.mrf.mxu1 }
 0x5c4   :  { %v2014_v6 = vadd.f32 %v789_v10, %v643_v50  ;;  %v885_v36 = vadd.f32 %v883_v5, %v2012_v53 }
 0x5c6   :  { %v886_v7 = vsel %vm225_vm4, %v885_v36, -inf }
 0x5c7   :  { %887 = vmax.xlane.f32.xlu0 %v886_v7 }
 0x5cb   :  { %v974_v12 = vpop.f32.mrf.mxu1 }
 0x5cc   :  { %v1000_v24 = vadd.f32 %v999_v11, %v974_v12 }
 0x5ce   :  { %v1002_v17 = vadd.f32 %v1000_v24, %v2012_v53 }
 0x5d0   :  { %v1003_v19 = vsel %vm225_vm4, %v1002_v17, -inf }
 0x5d1   :  { %1004 = vmax.xlane.f32.xlu1 %v1003_v19 }
 0x63a   :  { %v888_v23 = vpop.xlane.xlu0 %887 }
 0x63b   :  { %v889_v28 = vsub.f32 %v885_v36, %v888_v23 }
 0x63d   :  { %v890_v30 = vmul.f32 1.442695, %v889_v28 }
 0x63f   :  { %1499 = vpow2.f32 %v890_v30 }
 0x644   :  { %v1005_v32 = vpop.xlane.xlu1 %1004 }
 0x645   :  { %v1500_v33 = vpop.eup %1499  ;;  %v1006_v34 = vsub.f32 %v1002_v17, %v1005_v32 }
 0x646   :  { %1440 = vmatmul.msk.f32.vlgmr.msrb.gmra.mxu3 %vm225_vm4, %v1500_v33  ;;  %v892_v39 = vsel %vm225_vm4, %v1500_v33, 0.0 }
 0x647   :  { %v1007_v18 = vmul.f32 1.442695, %v1006_v34 }
 0x649   :  { %1501 = vpow2.f32 %v1007_v18 }
 0x64f   :  { %v1502_v9 = vpop.eup %1501 }
 0x650   :  { %1445 = vmatmul.msk.f32.vlgmr.msra.gmra.mxu0 %vm225_vm4, %v1502_v9  ;;  %v1009_v16 = vsel %vm225_vm4, %v1502_v9, 0.0 }
 0x651   :  { %1456 = vmatpush.xpose.msk.msra.mxu0 %vm170_vm3, %v1165_v37  ;;  %1010 = vadd.xlane.f32.xlu2 %v1009_v16 }
 0x658   :  { %1451 = vmatmul.msk.f32.vlgmr.msrb.gmra.mxu0 %vm170_vm3, %v1162_v35 }
 0x659   :  { %893 = vadd.xlane.f32.xlu2 %v892_v39 }
 0x660   :  { %1457 = vmatmul.msk.f32.vlgmr.msra.gmra.mxu0 %vm170_vm3, %v1307_v27 }
 0x671   :  { %143 = vrot.lane.b32.xlu2 %v1723_v22, %s1597_s16 }
 0x679   :  { %1113 = vrot.lane.b32.xlu2 %v1976_v41, %s1597_s16  ;;  %v1157_v41 = vpop.f32.mrf.mxu2 }
 0x681   :  { %v1302_v29 = vpop.f32.mrf.mxu2 }
 0x6c4   :  { %v1011_v38 = vpop.xlane.xlu2 %1010 }
 0x6c5   :  { %1503 = vrcp.f32 %v1011_v38  ;;  %v1046_v58 = vand.u32 2147483648, %v1011_v38  ;;  %v1044_v63 = vand.u32 2147483647, %v1011_v38  ;;  %vm1040_vm3 = vweird.f32 %v1011_v38 }
 0x6c7   :  { %v1047_v22 = vor.u32 1.1754944e-38, %v1046_v58  ;;  %vm1045_vm12 = vcmp.eq.f32.partialorder %v1044_v63, 8.507059e+37 }
 0x6c9   :  { %v919_v60 = vpop.f32.mrf.mxu3 }
 0x6cb   :  { %v1504_v40 = vpop.eup %1503 }
 0x6cc   :  { %v1036_v61 = vmul.f32 %v1504_v40, %v1011_v38  ;;  %v894_v42 = vpop.xlane.xlu2 %893  ;;  %vm1041_vm8 = vweird.f32 %v1504_v40 }
 0x6cd   :  { %1505 = vrcp.f32 %v894_v42  ;;  %v1032_v48 = vpop.f32.mrf.mxu0  ;;  %vm1042_vm10 = vmor %vm1040_vm3, %vm1041_vm8  ;;  %v933_v20 = vand.u32 2147483648, %v894_v42  ;;  %v931_v21 = vand.u32 2147483647, %v894_v42  ;;  %vm927_vm14 = vweird.f32 %v894_v42 }
 0x6ce   :  { %v1037_v13 = vsub.f32 1.0, %v1036_v61 }
 0x6cf   :  { %v934_v59 = vor.u32 1.1754944e-38, %v933_v20  ;;  %vm932_vm1 = vcmp.eq.f32.partialorder %v931_v21, 8.507059e+37 }
 0x6d0   :  { %v1038_v1 = vmul.f32 %v1504_v40, %v1037_v13 }
 0x6d2   :  { %v1039_v43 = vadd.f32 %v1504_v40, %v1038_v1 }
 0x6d3   :  { %v1506_v44 = vpop.eup %1505 }
 0x6d4   :  { %v923_v45 = vmul.f32 %v1506_v44, %v894_v42  ;;  %v1043_v3 = vsel %vm1042_vm10, %v1504_v40, %v1039_v43  ;;  %v144_v46 = vpop.permute.xlu2 %143  ;;  %vm928_vm13 = vweird.f32 %v1506_v44 }
 0x6d5   :  { %v1048_v47 = vsel %vm1045_vm12, %v1047_v22, %v1043_v3  ;;  %147 = vst.msk [vmem:[%s2089_s6] sm:$0xff] %vm146_vm9, %v144_v46  ;;  %v1187_v51 = vpop.f32.mrf.mxu0  ;;  %vm929_vm15 = vmor %vm927_vm14, %vm928_vm13 }
 0x6d6   :  { %v924_v52 = vsub.f32 1.0, %v923_v45  ;;  %v1049_v55 = vmul.f32 %v1048_v47, %v1032_v48  ;;  %v1188_v4 = vadd.f32 %v1187_v51, %v1157_v41  ;;  %476 = vst.msk [vmem:[%s2089_s6] sm:$0xff] %vm475_vm11, %v1837_v26 }
 0x6d8   :  { %v925_v31 = vmul.f32 %v1506_v44, %v924_v52  ;;  %1446 = vmatmul.msk.f32.vlgmr.msra.gmra.mxu3 %vm225_vm4, %v1049_v55  ;;  %v1190_v56 = vadd.f32 %v1188_v4, %v2012_v53 }
 0x6da   :  { %v926_v57 = vadd.f32 %v1506_v44, %v925_v31  ;;  %v1191_v49 = vsel %vm225_vm4, %v1190_v56, -inf }
 0x6db   :  { %1192 = vmax.xlane.f32.xlu1 %v1191_v49 }
 0x6dc   :  { %v930_v37 = vsel %vm929_vm15, %v1506_v44, %v926_v57 }
 0x6dd   :  { %v935_v26 = vsel %vm932_vm1, %v934_v59, %v930_v37  ;;  %v1327_v50 = vpop.f32.mrf.mxu0 }
 0x6de   :  { %v1328_v8 = vadd.f32 %v1327_v50, %v1302_v29  ;;  %v936_v0 = vmul.f32 %v935_v26, %v919_v60 }
 0x6e0   :  { %1447 = vmatmul.msk.f32.vlgmr.msra.gmra.mxu1 %vm225_vm4, %v936_v0  ;;  %v1330_v2 = vadd.f32 %v1328_v8, %v2012_v53 }
 0x6e1   :  { %1397 = vmatpush.msra.mxu1 %v1960_v62 }
 0x6e2   :  { %v1331_v5 = vsel %vm225_vm4, %v1330_v2, -inf }
 0x6e3   :  { %1332 = vmax.xlane.f32.xlu1 %v1331_v5 }
 0x6fc   :  { %1200 = vrot.lane.b32.xlu1 %v1703_v14, %s1613_s13 }
 0x74e   :  { %v1193_v10 = vpop.xlane.xlu1 %1192 }
 0x74f   :  { %v1194_v36 = vsub.f32 %v1190_v56, %v1193_v10 }
 0x751   :  { %v1195_v7 = vmul.f32 1.442695, %v1194_v36 }
 0x753   :  { %1507 = vpow2.f32 %v1195_v7 }
 0x756   :  { %v1333_v11 = vpop.xlane.xlu1 %1332 }
 0x757   :  { %v1334_v12 = vsub.f32 %v1330_v2, %v1333_v11 }
 0x759   :  { %v1508_v24 = vpop.eup %1507  ;;  %v1335_v17 = vmul.f32 1.442695, %v1334_v12 }
 0x75a   :  { %v1197_v19 = vsel %vm225_vm4, %v1508_v24, 0.0 }
 0x75b   :  { %1509 = vpow2.f32 %v1335_v17  ;;  %1198 = vadd.xlane.f32.xlu0 %v1197_v19  ;;  %v1071_v35 = vpop.f32.mrf.mxu3 }
 0x75d   :  { %v1094_v3 = vpop.f32.mrf.mxu1 }
 0x75e   :  { %v1095_v47 = vadd.f32 %v1094_v3, %v1071_v35 }
 0x761   :  { %v1510_v53 = vpop.eup %1509 }
 0x762   :  { %v1337_v62 = vsel %vm225_vm4, %v1510_v53, 0.0 }
 0x763   :  { %1338 = vadd.xlane.f32.xlu1 %v1337_v62 }
 0x76e   :  { %v1201_v23 = vpop.permute.xlu1 %1200 }
 0x76f   :  { %812 = vrot.lane.b32.xlu0 %v1905_v25, %s1597_s16  ;;  %1221 = vmatpush.msrb.mxu3 %v1201_v23  ;;  %v1114_v25 = vpop.permute.xlu2 %1113 }
 0x770   :  { %1452 = vmatmul.msk.f32.vlgmr.msrb.gmra.mxu3 %vm225_vm4, %v1508_v24 }
 0x771   :  { %1358 = vmatpush.msra.mxu3 %v1201_v23 }
 0x777   :  { %478 = vrot.lane.b32.xlu0 %v1825_v15, %s1597_s16 }
 0x778   :  { %1458 = vmatmul.msk.f32.vlgmr.msra.gmra.mxu3 %vm225_vm4, %v1510_v53 }
 0x7ce   :  { %v1199_v14 = vpop.xlane.xlu0 %1198 }
 0x7cf   :  { %1511 = vrcp.f32 %v1199_v14  ;;  %v1237_v27 = vand.u32 2147483648, %v1199_v14  ;;  %vm1231_vm6 = vweird.f32 %v1199_v14  ;;  %v1235_v38 = vand.u32 2147483647, %v1199_v14 }
 0x7d1   :  { %v1238_v42 = vor.u32 1.1754944e-38, %v1237_v27  ;;  %vm1236_vm8 = vcmp.eq.f32.partialorder %v1235_v38, 8.507059e+37 }
 0x7d5   :  { %v1512_v30 = vpop.eup %1511 }
 0x7d6   :  { %v1339_v28 = vpop.xlane.xlu1 %1338  ;;  %v1227_v32 = vmul.f32 %v1512_v30, %v1199_v14  ;;  %vm1232_vm5 = vweird.f32 %v1512_v30 }
 0x7d7   :  { %1513 = vrcp.f32 %v1339_v28  ;;  %vm1233_vm7 = vmor %vm1231_vm6, %vm1232_vm5  ;;  %v1374_v63 = vand.u32 2147483648, %v1339_v28 }
 0x7d8   :  { %v1228_v15 = vsub.f32 1.0, %v1227_v32 }
 0x7d9   :  { %v1375_v44 = vor.u32 1.1754944e-38, %v1374_v63 }
 0x7da   :  { %v1229_v9 = vmul.f32 %v1512_v30, %v1228_v15 }
 0x7dc   :  { %v1230_v39 = vadd.f32 %v1512_v30, %v1229_v9 }
 0x7dd   :  { %v1514_v34 = vpop.eup %1513 }
 0x7de   :  { %v1364_v18 = vmul.f32 %v1514_v34, %v1339_v28  ;;  %v1234_v61 = vsel %vm1233_vm7, %v1512_v30, %v1230_v39  ;;  %vm1369_vm3 = vweird.f32 %v1514_v34 }
 0x7df   :  { %v1239_v13 = vsel %vm1236_vm8, %v1238_v42, %v1234_v61 }
 0x7e1   :  { %v813_v33 = vpop.permute.xlu0 %812 }
 0x7e2   :  { %815 = vst.msk [vmem:[%s2089_s6 + $0x8] sm:$0xff] %vm146_vm9, %v813_v33  ;;  %vm1368_vm9 = vweird.f32 %v1339_v28 }
 0x7e3   :  { %1111 = vst.msk [vmem:[%s2089_s6 + $0x8] sm:$0xff] %vm475_vm11, %v1989_v54  ;;  %v1365_v54 = vsub.f32 1.0, %v1364_v18  ;;  %vm1370_vm10 = vmor %vm1368_vm9, %vm1369_vm3 }
 0x7e4   :  { %1116 = vst.msk [vmem:[%s2089_s6 + $0x8] sm:$0xff] %vm481_vm2, %v1114_v25 }
 0x7e5   :  { %v1366_v40 = vmul.f32 %v1514_v34, %v1365_v54 }
 0x7e7   :  { %v1367_v1 = vadd.f32 %v1514_v34, %v1366_v40 }
 0x7e9   :  { %v479_v16 = vpop.permute.xlu0 %478  ;;  %v1371_v43 = vsel %vm1370_vm10, %v1514_v34, %v1367_v1 }
 0x7ea   :  { %482 = vst.msk [vmem:[%s2089_s6] sm:$0xff] %vm481_vm2, %v479_v16 }
 0x7eb   :  { %793 = vst.msk [vmem:[%s2089_s6] sm:$0xff] %vm76_vm0, %v2014_v6  ;;  %v1372_v6 = vand.u32 2147483647, %v1339_v28 }
 0x7ed   :  { %vm1373_vm11 = vcmp.eq.f32.partialorder %v1372_v6, 8.507059e+37 }
 0x7ee   :  { %v1376_v41 = vsel %vm1373_vm11, %v1375_v44, %v1371_v43 }
 0x7f3   :  { %v1223_v48 = vpop.f32.mrf.mxu3 }
 0x7f4   :  { %v1240_v58 = vmul.f32 %v1239_v13, %v1223_v48 }
 0x7f6   :  { %1453 = vmatmul.msk.f32.vlgmr.msrb.gmra.mxu1 %vm225_vm4, %v1240_v58 }
 0x7fb   :  { %v1360_v22 = vpop.f32.mrf.mxu3 }
 0x7fc   :  { %v1377_v45 = vmul.f32 %v1376_v41, %v1360_v22 }
 0x7fe   :  { %1459 = vmatmul.msk.f32.vlgmr.msra.gmra.mxu1 %vm225_vm4, %v1377_v45 }
 0x873   :  { %v1262_v46 = vpop.f32.mrf.mxu1 }
 0x874   :  { %v1265_v51 = vadd.f32 %v1262_v46, %v1095_v47 }
 0x87b   :  { %v1399_v52 = vpop.f32.mrf.mxu1 }
 0x87c   :  { %v1402_v55 = vadd.f32 %v1399_v52, %v1265_v51 }
 0x87e   :  { %1403 = vst.msk [vmem:[%s2089_s6 + $0x8] sm:$0xff] %vm76_vm0, %v1402_v55 }
 0x87f   :  { %1408 = vsyncpa [#allocation3], 1 }
 0x880   :  { %1409 = vsyncpa [#allocation5], 1 }

</bundles_post_ra>
